<compile_context>
chip_gen: v5e
topology: v5e:2x2
jax: 0.10.0
libtpu: 0.0.40
codegen_flags: <defaults>
</compile_context>

<pallas_src>
import functools
import numpy as np
import jax
import jax.numpy as jnp
from jax.experimental import pallas as pl
from jax.experimental.pallas import tpu as pltpu

# ----- feature dict (f_dict) and model hyper-params -----
F_E, F_X, F_U, H, F_OUT = 4, 4, 4, 16, 8   # f_e, f_x, f_u, h, f_out
N_ITERS = 3                                # RecurrentGraphEmbedding.N
assert F_X == F_U, "GlobalModel_NodeOnly outputs f_x and it is fed back as u"


# ======================= host-side packing =======================

def _split_rows(w, sizes):
    parts, off = [], 0
    for s in sizes:
        parts.append(w[off:off + s])
        off += s
    assert off == w.shape[0]
    return tuple(parts)


def _fused_gnn_weights(p, f_u_in):
    """Split each MLP's layer-1 weight by concat segment and re-fuse column-wise
    so each GNN block needs one x-projection and one u-projection matmul."""
    w1e, b1e, w2e, b2e = p['edge']
    w1x, b1x, w2x, b2x = p['node']
    w1u, b1u, w2u, b2u = p['glob']
    w_src, w_dst, w_e, w_u_e = _split_rows(w1e, [F_X, F_X, F_E, f_u_in])
    w_x, w_en, w_u_x = _split_rows(w1x, [F_X, F_E, f_u_in])
    w_gx, w_u_g = _split_rows(w1u, [F_X, f_u_in])
    return {
        'xproj': jnp.concatenate([w_src, w_dst, w_x], axis=1),    # [F_X, 3H]
        'uproj': jnp.concatenate([w_u_e, w_u_x, w_u_g], axis=1),  # [f_u_in, 3H]
        'w_e': w_e, 'b1e': b1e, 'w2e': w2e, 'b2e': b2e,
        'w_en': w_en, 'b1x': b1x, 'w2x': w2x, 'b2x': b2x,
        'w_gx': w_gx, 'b1u': b1u, 'w2u': w2u, 'b2u': b2u,
    }


def _fused_selectors(g, sfx):
    """[ssrc|sdst|bedge] and [adst|bnode]: one gather matmul per sub-model."""
    sel_e = jnp.concatenate([g['ssrc'], g['sdst'], g['bedge']], axis=1)  # [E, 2N+G]
    sel_n = jnp.concatenate([g['adst'], g['bnode']], axis=1)             # [N, E+G]
    return [('sel_e' + sfx, sel_e), ('sel_n' + sfx, sel_n),
            ('mnode' + sfx, g['mnode'])]


def _pack_slab(named):
    """Row-stack small 2-D f32 arrays into one slab at 8-aligned row offsets,
    zero-padded to a common lane width.  Returns (slab, {name: (row, nr, nc)})."""
    width = max(int(a.shape[1]) for _, a in named)
    offs, parts, r = {}, [], 0
    for name, a in named:
        a = jnp.asarray(a, jnp.float32)
        nr, nc = int(a.shape[0]), int(a.shape[1])
        pr = (-nr) % 8
        parts.append(jnp.pad(a, ((0, pr), (0, width - nc))))
        offs[name] = (r, nr, nc)
        r += nr + pr
    return jnp.concatenate(parts, axis=0), offs


# ======================= fused Pallas forward =======================

def parallel_forward(g1, g2, p1, p2, pm, n_iters):
    """Whole RecurrentGraphEmbedding.forward fused into one pallas_call."""
    n_graphs = g1['u'].shape[0]

    # ---- item 1: pack everything into 3 aligned slabs (3 DMAs total) ----
    s_slab, s_offs = _pack_slab([
        ('x1', g1['x']), ('e1', g1['e']), ('u1', g1['u']),
        ('x2', g2['x']), ('e2', g2['e']), ('u2', g2['u'])])
    sel_slab, sel_offs = _pack_slab(
        _fused_selectors(g1, '1') + _fused_selectors(g2, '2'))

    fw1 = _fused_gnn_weights(p1, F_U)        # gnn1: f_u globals
    fw2 = _fused_gnn_weights(p2, 2 * F_U)    # gnn2: 2*f_u globals (cat([u2, u1]))
    wm1, bm1, wm2, bm2 = pm
    w_named = ([('g1_' + k, v) for k, v in fw1.items()]
               + [('g2_' + k, v) for k, v in fw2.items()]
               + [('m_w1', wm1), ('m_b1', bm1), ('m_w2', wm2), ('m_b2', bm2)])
    w_slab, w_offs = _pack_slab(w_named)

    dot = functools.partial(jnp.dot, preferred_element_type=jnp.float32)

    def kernel(s_ref, c_ref, w_ref, out_ref):
        def rd(ref, offs, name):                 # static sub-view -> one small load
            r, nr, nc = offs[name]
            return ref[r:r + nr, 0:nc]
        st = lambda n: rd(s_ref, s_offs, n)
        cs = lambda n: rd(c_ref, sel_offs, n)
        wt = lambda n: rd(w_ref, w_offs, n)

        def gnn_block(x, e, u_in, pfx, sfx):
            # items 2+3: fused projections + fused gather matmuls
            xp = dot(x, wt(pfx + 'xproj'))       # [N, 3H] : src | dst | node-x
            up = dot(u_in, wt(pfx + 'uproj'))    # [G, 3H] : edge | node | glob
            p_src, p_dst, x_n = xp[:, :H], xp[:, H:2 * H], xp[:, 2 * H:]
            gu_e, gu_n, gu_g = up[:, :H], up[:, H:2 * H], up[:, 2 * H:]

            # EdgeModel: phi_e(cat([x[src], x[dst], e, u[batch[src]]], 1))
            h = jnp.maximum(
                dot(cs('sel_e' + sfx),
                    jnp.concatenate([p_src, p_dst, gu_e], axis=0))   # [E, H]
                + dot(e, wt(pfx + 'w_e')) + wt(pfx + 'b1e'), 0.0)
            e_new = dot(h, wt(pfx + 'w2e')) + wt(pfx + 'b2e')

            # NodeModel: phi_x(cat([x, scatter_mean(e_new, dst), u[batch]], 1))
            h = jnp.maximum(
                x_n
                + dot(cs('sel_n' + sfx),
                      jnp.concatenate([dot(e_new, wt(pfx + 'w_en')), gu_n],
                                      axis=0))                       # [N, H]
                + wt(pfx + 'b1x'), 0.0)
            x_new = dot(h, wt(pfx + 'w2x')) + wt(pfx + 'b2x')

            # GlobalModel_NodeOnly: phi_u(cat([scatter_mean(x_new, batch), u], 1))
            h = jnp.maximum(
                dot(dot(cs('mnode' + sfx), x_new), wt(pfx + 'w_gx'))
                + gu_g + wt(pfx + 'b1u'), 0.0)
            u_new = dot(h, wt(pfx + 'w2u')) + wt(pfx + 'b2u')
            return x_new, e_new, u_new

        x1, e1, u1 = st('x1'), st('e1'), st('u1')
        x2, e2, u2 = st('x2'), st('e2'), st('u2')
        wm1v, bm1v = wt('m_w1'), wt('m_b1')
        wm2v, bm2v = wt('m_w2'), wt('m_b2')

        outs = []
        for _ in range(n_iters):                 # static unroll; carries stay on-chip
            x1, e1, u1 = gnn_block(x1, e1, u1, 'g1_', '1')
            # u2 <- cat([u2, u1], 1) feeds gnn2's fused u-projection directly.
            x2, e2, u2 = gnn_block(x2, e2, jnp.concatenate([u2, u1], axis=1),
                                   'g2_', '2')
            outs.append(dot(jnp.maximum(dot(u2, wm1v) + bm1v, 0.0), wm2v) + bm2v)
        # item 4: buffer per-iteration outputs; ONE store at the end.
        out_ref[...] = jnp.concatenate(outs, axis=1)   # [G, n_iters*F_OUT]

    out = pl.pallas_call(
        kernel,
        out_shape=jax.ShapeDtypeStruct((n_graphs, n_iters * F_OUT), jnp.float32),
        in_specs=[pl.BlockSpec(memory_space=pltpu.MemorySpace.VMEM)] * 3,
        out_specs=pl.BlockSpec(memory_space=pltpu.MemorySpace.VMEM),
    )(s_slab, sel_slab, w_slab)
    return [out[:, i * F_OUT:(i + 1) * F_OUT] for i in range(n_iters)]


# ======================= pure-JAX reference =======================

def _hdot(a, b):
    return jnp.dot(a, b, precision=jax.lax.Precision.HIGHEST)


def _mlp_ref(x, p):
    w1, b1, w2, b2 = p
    return _hdot(jnp.maximum(_hdot(x, w1) + b1, 0.0), w2) + b2


def _segment_mean(vals, idx, num_segments):
    s = jax.ops.segment_sum(vals, idx, num_segments=num_segments)
    cnt = jax.ops.segment_sum(jnp.ones((vals.shape[0],), vals.dtype), idx,
                              num_segments=num_segments)
    return s / jnp.maximum(cnt, 1.0)[:, None]


def _gnn_ref(x, e, u, g, p):
    src, dst, batch = g['src'], g['dst'], g['batch']
    e_new = _mlp_ref(jnp.concatenate([x[src], x[dst], e, u[batch[src]]], 1), p['edge'])
    e_agg = _segment_mean(e_new, dst, x.shape[0])
    x_new = _mlp_ref(jnp.concatenate([x, e_agg, u[batch]], 1), p['node'])
    x_agg = _segment_mean(x_new, batch, u.shape[0])
    u_new = _mlp_ref(jnp.concatenate([x_agg, u], 1), p['glob'])
    return x_new, e_new, u_new


def parallel_forward_ref(g1, g2, p1, p2, pm, n_iters):
    x1, e1, u1 = g1['x'], g1['e'], g1['u']
    x2, e2, u2 = g2['x'], g2['e'], g2['u']
    outs = []
    for _ in range(n_iters):
        x1, e1, u1 = _gnn_ref(x1, e1, u1, g1, p1)
        u2_cat = jnp.concatenate([u2, u1], 1)          # u2 = torch.cat([u2, u1], 1)
        x2, e2, u2 = _gnn_ref(x2, e2, u2_cat, g2, p2)
        outs.append(_mlp_ref(u2, pm))                  # mlp(u2)
    return outs


# ======================= setup (glue) =======================

def init_linear(key, fin, fout):
    kw, kb = jax.random.split(key)
    lim = 1.0 / np.sqrt(fin)
    w = jax.random.uniform(kw, (fin, fout), jnp.float32, -lim, lim)
    b = jax.random.uniform(kb, (1, fout), jnp.float32, -lim, lim)
    return w, b


def init_mlp(key, fin, fout, hidden=H):
    k1, k2 = jax.random.split(key)
    w1, b1 = init_linear(k1, fin, hidden)
    w2, b2 = init_linear(k2, hidden, fout)
    return (w1, b1, w2, b2)


def init_gnn_params(key, f_u_in):
    ke, kx, ku = jax.random.split(key, 3)
    return {
        'edge': init_mlp(ke, 2 * F_X + F_E + f_u_in, F_E),   # EdgeModel
        'node': init_mlp(kx, F_X + F_E + f_u_in, F_X),       # NodeModel
        'glob': init_mlp(ku, F_X + f_u_in, F_X),              # GlobalModel_NodeOnly
    }


def make_graph(key, n_graphs=2, nodes_per_graph=4):
    """Batch of fully-connected graphs + dense gather/scatter matrices."""
    n_nodes = n_graphs * nodes_per_graph
    src_l, dst_l = [], []
    for g in range(n_graphs):
        off = g * nodes_per_graph
        for i in range(nodes_per_graph):
            for j in range(nodes_per_graph):
                if i != j:
                    src_l.append(off + i)
                    dst_l.append(off + j)
    src = np.asarray(src_l, np.int32)
    dst = np.asarray(dst_l, np.int32)
    batch = np.repeat(np.arange(n_graphs), nodes_per_graph).astype(np.int32)

    k1, k2, k3 = jax.random.split(key, 3)
    x = jax.random.normal(k1, (n_nodes, F_X), jnp.float32)
    e = jax.random.normal(k2, (src.shape[0], F_E), jnp.float32)
    u = jax.random.normal(k3, (n_graphs, F_U), jnp.float32)

    eye_n = np.eye(n_nodes, dtype=np.float32)
    eye_g = np.eye(n_graphs, dtype=np.float32)
    ssrc = eye_n[src]                                   # [E, N]  x[src] gather
    sdst = eye_n[dst]                                   # [E, N]  x[dst] gather
    deg = np.maximum(np.bincount(dst, minlength=n_nodes), 1).astype(np.float32)
    adst = sdst.T / deg[:, None]                        # [N, E]  scatter-mean e->node
    bnode = eye_g[batch]                                # [N, G]  u[batch] gather
    bedge = eye_g[batch[src]]                           # [E, G]  u[batch[src]] gather
    cnt = np.maximum(np.bincount(batch, minlength=n_graphs), 1).astype(np.float32)
    mnode = bnode.T / cnt[:, None]                      # [G, N]  scatter-mean x->global

    return {
        'x': x, 'e': e, 'u': u,
        'src': jnp.asarray(src), 'dst': jnp.asarray(dst), 'batch': jnp.asarray(batch),
        'ssrc': jnp.asarray(ssrc), 'sdst': jnp.asarray(sdst), 'adst': jnp.asarray(adst),
        'bedge': jnp.asarray(bedge), 'bnode': jnp.asarray(bnode), 'mnode': jnp.asarray(mnode),
    }


if __name__ == "__main__":
    root = jax.random.PRNGKey(0)
    kg1, kg2, kp1, kp2, kpm = jax.random.split(root, 5)

    graph1 = make_graph(kg1, n_graphs=2, nodes_per_graph=4)   # 8 nodes, 24 edges
    graph2 = make_graph(kg2, n_graphs=2, nodes_per_graph=4)
    params_gnn1 = init_gnn_params(kp1, F_U)          # gnn1: f_u globals
    params_gnn2 = init_gnn_params(kp2, 2 * F_U)      # gnn2: 2*f_u globals (cat([u2, u1]))
    params_mlp = init_mlp(kpm, F_U, F_OUT)           # final mlp: f_u -> f_out

    out_list = parallel_forward(graph1, graph2, params_gnn1, params_gnn2,
                                params_mlp, N_ITERS)
    out_list = [jax.block_until_ready(o) for o in out_list]

    ref_list = parallel_forward_ref(graph1, graph2, params_gnn1, params_gnn2,
                                    params_mlp, N_ITERS)
    for o, r in zip(out_list, ref_list):
        np.testing.assert_allclose(np.asarray(o), np.asarray(r), rtol=1e-3, atol=1e-3)

    print("KERNEL_OK")
</pallas_src>

<mosaic_0001>
module attributes {stable_mosaic.version = 11 : i64} {
  func.func @kernel(%arg0: memref<80x4xf32, #tpu.memory_space<vmem>>, %arg1: memref<80x26xf32, #tpu.memory_space<vmem>>, %arg2: memref<312x48xf32, #tpu.memory_space<vmem>>, %arg3: memref<2x24xf32, #tpu.memory_space<vmem>>) attributes {dimension_semantics = [], scalar_prefetch = 0 : i64, scratch_operands = 0 : i64, tpu.core_type = #tpu.core_type<tc>} {
    %c0 = arith.constant 0 : index
    %c0_0 = arith.constant 0 : index
    %0 = vector.load %arg0[%c0, %c0_0] : memref<80x4xf32, #tpu.memory_space<vmem>>, vector<8x4xf32>
    %c8 = arith.constant 8 : index
    %c0_1 = arith.constant 0 : index
    %1 = vector.load %arg0[%c8, %c0_1] : memref<80x4xf32, #tpu.memory_space<vmem>>, vector<24x4xf32>
    %c32 = arith.constant 32 : index
    %c0_2 = arith.constant 0 : index
    %2 = vector.load %arg0[%c32, %c0_2] : memref<80x4xf32, #tpu.memory_space<vmem>>, vector<2x4xf32>
    %c40 = arith.constant 40 : index
    %c0_3 = arith.constant 0 : index
    %3 = vector.load %arg0[%c40, %c0_3] : memref<80x4xf32, #tpu.memory_space<vmem>>, vector<8x4xf32>
    %c48 = arith.constant 48 : index
    %c0_4 = arith.constant 0 : index
    %4 = vector.load %arg0[%c48, %c0_4] : memref<80x4xf32, #tpu.memory_space<vmem>>, vector<24x4xf32>
    %c72 = arith.constant 72 : index
    %c0_5 = arith.constant 0 : index
    %5 = vector.load %arg0[%c72, %c0_5] : memref<80x4xf32, #tpu.memory_space<vmem>>, vector<2x4xf32>
    %c272 = arith.constant 272 : index
    %c0_6 = arith.constant 0 : index
    %6 = vector.load %arg2[%c272, %c0_6] : memref<312x48xf32, #tpu.memory_space<vmem>>, vector<4x16xf32>
    %c280 = arith.constant 280 : index
    %c0_7 = arith.constant 0 : index
    %7 = vector.load %arg2[%c280, %c0_7] : memref<312x48xf32, #tpu.memory_space<vmem>>, vector<1x16xf32>
    %c288 = arith.constant 288 : index
    %c0_8 = arith.constant 0 : index
    %8 = vector.load %arg2[%c288, %c0_8] : memref<312x48xf32, #tpu.memory_space<vmem>>, vector<16x8xf32>
    %c304 = arith.constant 304 : index
    %c0_9 = arith.constant 0 : index
    %9 = vector.load %arg2[%c304, %c0_9] : memref<312x48xf32, #tpu.memory_space<vmem>>, vector<1x8xf32>
    %c0_10 = arith.constant 0 : index
    %c0_11 = arith.constant 0 : index
    %10 = vector.load %arg2[%c0_10, %c0_11] : memref<312x48xf32, #tpu.memory_space<vmem>>, vector<4x48xf32>
    %cst = arith.constant dense<0.000000e+00> : vector<8x48xf32>
    %11 = tpu.matmul %0, %10, %cst {dimension_numbers = #tpu.dot_dimension_numbers<[1], [0], [0], [1], [0, 0, 1, 1], [], []>} : vector<8x4xf32>, vector<4x48xf32>, vector<8x48xf32> -> vector<8x48xf32>
    %c8_12 = arith.constant 8 : index
    %c0_13 = arith.constant 0 : index
    %12 = vector.load %arg2[%c8_12, %c0_13] : memref<312x48xf32, #tpu.memory_space<vmem>>, vector<4x48xf32>
    %cst_14 = arith.constant dense<0.000000e+00> : vector<2x48xf32>
    %13 = tpu.matmul %2, %12, %cst_14 {dimension_numbers = #tpu.dot_dimension_numbers<[1], [0], [0], [1], [0, 0, 1, 1], [], []>} : vector<2x4xf32>, vector<4x48xf32>, vector<2x48xf32> -> vector<2x48xf32>
    %14 = vector.extract_strided_slice %11 {offsets = [0, 0], sizes = [8, 16], strides = [1, 1]} : vector<8x48xf32> to vector<8x16xf32>
    %15 = vector.extract_strided_slice %11 {offsets = [0, 16], sizes = [8, 16], strides = [1, 1]} : vector<8x48xf32> to vector<8x16xf32>
    %16 = vector.extract_strided_slice %11 {offsets = [0, 32], sizes = [8, 16], strides = [1, 1]} : vector<8x48xf32> to vector<8x16xf32>
    %17 = vector.extract_strided_slice %13 {offsets = [0, 0], sizes = [2, 16], strides = [1, 1]} : vector<2x48xf32> to vector<2x16xf32>
    %18 = vector.extract_strided_slice %13 {offsets = [0, 16], sizes = [2, 16], strides = [1, 1]} : vector<2x48xf32> to vector<2x16xf32>
    %19 = vector.extract_strided_slice %13 {offsets = [0, 32], sizes = [2, 16], strides = [1, 1]} : vector<2x48xf32> to vector<2x16xf32>
    %c0_15 = arith.constant 0 : index
    %c0_16 = arith.constant 0 : index
    %20 = vector.load %arg1[%c0_15, %c0_16] : memref<80x26xf32, #tpu.memory_space<vmem>>, vector<24x18xf32>
    %21 = tpu.concatenate %14, %15, %17 in 0 : vector<8x16xf32>, vector<8x16xf32>, vector<2x16xf32> -> vector<18x16xf32>
    %cst_17 = arith.constant dense<0.000000e+00> : vector<24x16xf32>
    %22 = tpu.matmul %20, %21, %cst_17 {dimension_numbers = #tpu.dot_dimension_numbers<[1], [0], [0], [1], [0, 0, 1, 1], [], []>} : vector<24x18xf32>, vector<18x16xf32>, vector<24x16xf32> -> vector<24x16xf32>
    %c16 = arith.constant 16 : index
    %c0_18 = arith.constant 0 : index
    %23 = vector.load %arg2[%c16, %c0_18] : memref<312x48xf32, #tpu.memory_space<vmem>>, vector<4x16xf32>
    %cst_19 = arith.constant dense<0.000000e+00> : vector<24x16xf32>
    %24 = tpu.matmul %1, %23, %cst_19 {dimension_numbers = #tpu.dot_dimension_numbers<[1], [0], [0], [1], [0, 0, 1, 1], [], []>} : vector<24x4xf32>, vector<4x16xf32>, vector<24x16xf32> -> vector<24x16xf32>
    %25 = arith.addf %22, %24 : vector<24x16xf32>
    %c24 = arith.constant 24 : index
    %c0_20 = arith.constant 0 : index
    %26 = vector.load %arg2[%c24, %c0_20] : memref<312x48xf32, #tpu.memory_space<vmem>>, vector<1x16xf32>
    %27 = vector.broadcast %26 : vector<1x16xf32> to vector<24x16xf32>
    %28 = arith.addf %25, %27 : vector<24x16xf32>
    %cst_21 = arith.constant 0.000000e+00 : f32
    %29 = vector.broadcast %cst_21 : f32 to vector<24x16xf32>
    %30 = arith.maximumf %28, %29 : vector<24x16xf32>
    %c32_22 = arith.constant 32 : index
    %c0_23 = arith.constant 0 : index
    %31 = vector.load %arg2[%c32_22, %c0_23] : memref<312x48xf32, #tpu.memory_space<vmem>>, vector<16x4xf32>
    %cst_24 = arith.constant dense<0.000000e+00> : vector<24x4xf32>
    %32 = tpu.matmul %30, %31, %cst_24 {dimension_numbers = #tpu.dot_dimension_numbers<[1], [0], [0], [1], [0, 0, 1, 1], [], []>} : vector<24x16xf32>, vector<16x4xf32>, vector<24x4xf32> -> vector<24x4xf32>
    %c48_25 = arith.constant 48 : index
    %c0_26 = arith.constant 0 : index
    %33 = vector.load %arg2[%c48_25, %c0_26] : memref<312x48xf32, #tpu.memory_space<vmem>>, vector<1x4xf32>
    %34 = vector.broadcast %33 : vector<1x4xf32> to vector<24x4xf32>
    %35 = arith.addf %32, %34 : vector<24x4xf32>
    %c24_27 = arith.constant 24 : index
    %c0_28 = arith.constant 0 : index
    %36 = vector.load %arg1[%c24_27, %c0_28] : memref<80x26xf32, #tpu.memory_space<vmem>>, vector<8x26xf32>
    %c56 = arith.constant 56 : index
    %c0_29 = arith.constant 0 : index
    %37 = vector.load %arg2[%c56, %c0_29] : memref<312x48xf32, #tpu.memory_space<vmem>>, vector<4x16xf32>
    %cst_30 = arith.constant dense<0.000000e+00> : vector<24x16xf32>
    %38 = tpu.matmul %35, %37, %cst_30 {dimension_numbers = #tpu.dot_dimension_numbers<[1], [0], [0], [1], [0, 0, 1, 1], [], []>} : vector<24x4xf32>, vector<4x16xf32>, vector<24x16xf32> -> vector<24x16xf32>
    %39 = tpu.concatenate %38, %18 in 0 : vector<24x16xf32>, vector<2x16xf32> -> vector<26x16xf32>
    %cst_31 = arith.constant dense<0.000000e+00> : vector<8x16xf32>
    %40 = tpu.matmul %36, %39, %cst_31 {dimension_numbers = #tpu.dot_dimension_numbers<[1], [0], [0], [1], [0, 0, 1, 1], [], []>} : vector<8x26xf32>, vector<26x16xf32>, vector<8x16xf32> -> vector<8x16xf32>
    %41 = arith.addf %16, %40 : vector<8x16xf32>
    %c64 = arith.constant 64 : index
    %c0_32 = arith.constant 0 : index
    %42 = vector.load %arg2[%c64, %c0_32] : memref<312x48xf32, #tpu.memory_space<vmem>>, vector<1x16xf32>
    %43 = vector.broadcast %42 : vector<1x16xf32> to vector<8x16xf32>
    %44 = arith.addf %41, %43 : vector<8x16xf32>
    %cst_33 = arith.constant 0.000000e+00 : f32
    %45 = vector.broadcast %cst_33 : f32 to vector<8x16xf32>
    %46 = arith.maximumf %44, %45 : vector<8x16xf32>
    %c72_34 = arith.constant 72 : index
    %c0_35 = arith.constant 0 : index
    %47 = vector.load %arg2[%c72_34, %c0_35] : memref<312x48xf32, #tpu.memory_space<vmem>>, vector<16x4xf32>
    %cst_36 = arith.constant dense<0.000000e+00> : vector<8x4xf32>
    %48 = tpu.matmul %46, %47, %cst_36 {dimension_numbers = #tpu.dot_dimension_numbers<[1], [0], [0], [1], [0, 0, 1, 1], [], []>} : vector<8x16xf32>, vector<16x4xf32>, vector<8x4xf32> -> vector<8x4xf32>
    %c88 = arith.constant 88 : index
    %c0_37 = arith.constant 0 : index
    %49 = vector.load %arg2[%c88, %c0_37] : memref<312x48xf32, #tpu.memory_space<vmem>>, vector<1x4xf32>
    %50 = vector.broadcast %49 : vector<1x4xf32> to vector<8x4xf32>
    %51 = arith.addf %48, %50 : vector<8x4xf32>
    %c32_38 = arith.constant 32 : index
    %c0_39 = arith.constant 0 : index
    %52 = vector.load %arg1[%c32_38, %c0_39] : memref<80x26xf32, #tpu.memory_space<vmem>>, vector<2x8xf32>
    %cst_40 = arith.constant dense<0.000000e+00> : vector<2x4xf32>
    %53 = tpu.matmul %52, %51, %cst_40 {dimension_numbers = #tpu.dot_dimension_numbers<[1], [0], [0], [1], [0, 0, 1, 1], [], []>} : vector<2x8xf32>, vector<8x4xf32>, vector<2x4xf32> -> vector<2x4xf32>
    %c96 = arith.constant 96 : index
    %c0_41 = arith.constant 0 : index
    %54 = vector.load %arg2[%c96, %c0_41] : memref<312x48xf32, #tpu.memory_space<vmem>>, vector<4x16xf32>
    %cst_42 = arith.constant dense<0.000000e+00> : vector<2x16xf32>
    %55 = tpu.matmul %53, %54, %cst_42 {dimension_numbers = #tpu.dot_dimension_numbers<[1], [0], [0], [1], [0, 0, 1, 1], [], []>} : vector<2x4xf32>, vector<4x16xf32>, vector<2x16xf32> -> vector<2x16xf32>
    %56 = arith.addf %55, %19 : vector<2x16xf32>
    %c104 = arith.constant 104 : index
    %c0_43 = arith.constant 0 : index
    %57 = vector.load %arg2[%c104, %c0_43] : memref<312x48xf32, #tpu.memory_space<vmem>>, vector<1x16xf32>
    %58 = vector.broadcast %57 : vector<1x16xf32> to vector<2x16xf32>
    %59 = arith.addf %56, %58 : vector<2x16xf32>
    %cst_44 = arith.constant 0.000000e+00 : f32
    %60 = vector.broadcast %cst_44 : f32 to vector<2x16xf32>
    %61 = arith.maximumf %59, %60 : vector<2x16xf32>
    %c112 = arith.constant 112 : index
    %c0_45 = arith.constant 0 : index
    %62 = vector.load %arg2[%c112, %c0_45] : memref<312x48xf32, #tpu.memory_space<vmem>>, vector<16x4xf32>
    %cst_46 = arith.constant dense<0.000000e+00> : vector<2x4xf32>
    %63 = tpu.matmul %61, %62, %cst_46 {dimension_numbers = #tpu.dot_dimension_numbers<[1], [0], [0], [1], [0, 0, 1, 1], [], []>} : vector<2x16xf32>, vector<16x4xf32>, vector<2x4xf32> -> vector<2x4xf32>
    %c128 = arith.constant 128 : index
    %c0_47 = arith.constant 0 : index
    %64 = vector.load %arg2[%c128, %c0_47] : memref<312x48xf32, #tpu.memory_space<vmem>>, vector<1x4xf32>
    %65 = vector.broadcast %64 : vector<1x4xf32> to vector<2x4xf32>
    %66 = arith.addf %63, %65 : vector<2x4xf32>
    %67 = tpu.concatenate %5, %66 in 1 : vector<2x4xf32>, vector<2x4xf32> -> vector<2x8xf32>
    %c136 = arith.constant 136 : index
    %c0_48 = arith.constant 0 : index
    %68 = vector.load %arg2[%c136, %c0_48] : memref<312x48xf32, #tpu.memory_space<vmem>>, vector<4x48xf32>
    %cst_49 = arith.constant dense<0.000000e+00> : vector<8x48xf32>
    %69 = tpu.matmul %3, %68, %cst_49 {dimension_numbers = #tpu.dot_dimension_numbers<[1], [0], [0], [1], [0, 0, 1, 1], [], []>} : vector<8x4xf32>, vector<4x48xf32>, vector<8x48xf32> -> vector<8x48xf32>
    %c144 = arith.constant 144 : index
    %c0_50 = arith.constant 0 : index
    %70 = vector.load %arg2[%c144, %c0_50] : memref<312x48xf32, #tpu.memory_space<vmem>>, vector<8x48xf32>
    %cst_51 = arith.constant dense<0.000000e+00> : vector<2x48xf32>
    %71 = tpu.matmul %67, %70, %cst_51 {dimension_numbers = #tpu.dot_dimension_numbers<[1], [0], [0], [1], [0, 0, 1, 1], [], []>} : vector<2x8xf32>, vector<8x48xf32>, vector<2x48xf32> -> vector<2x48xf32>
    %72 = vector.extract_strided_slice %69 {offsets = [0, 0], sizes = [8, 16], strides = [1, 1]} : vector<8x48xf32> to vector<8x16xf32>
    %73 = vector.extract_strided_slice %69 {offsets = [0, 16], sizes = [8, 16], strides = [1, 1]} : vector<8x48xf32> to vector<8x16xf32>
    %74 = vector.extract_strided_slice %69 {offsets = [0, 32], sizes = [8, 16], strides = [1, 1]} : vector<8x48xf32> to vector<8x16xf32>
    %75 = vector.extract_strided_slice %71 {offsets = [0, 0], sizes = [2, 16], strides = [1, 1]} : vector<2x48xf32> to vector<2x16xf32>
    %76 = vector.extract_strided_slice %71 {offsets = [0, 16], sizes = [2, 16], strides = [1, 1]} : vector<2x48xf32> to vector<2x16xf32>
    %77 = vector.extract_strided_slice %71 {offsets = [0, 32], sizes = [2, 16], strides = [1, 1]} : vector<2x48xf32> to vector<2x16xf32>
    %c40_52 = arith.constant 40 : index
    %c0_53 = arith.constant 0 : index
    %78 = vector.load %arg1[%c40_52, %c0_53] : memref<80x26xf32, #tpu.memory_space<vmem>>, vector<24x18xf32>
    %79 = tpu.concatenate %72, %73, %75 in 0 : vector<8x16xf32>, vector<8x16xf32>, vector<2x16xf32> -> vector<18x16xf32>
    %cst_54 = arith.constant dense<0.000000e+00> : vector<24x16xf32>
    %80 = tpu.matmul %78, %79, %cst_54 {dimension_numbers = #tpu.dot_dimension_numbers<[1], [0], [0], [1], [0, 0, 1, 1], [], []>} : vector<24x18xf32>, vector<18x16xf32>, vector<24x16xf32> -> vector<24x16xf32>
    %c152 = arith.constant 152 : index
    %c0_55 = arith.constant 0 : index
    %81 = vector.load %arg2[%c152, %c0_55] : memref<312x48xf32, #tpu.memory_space<vmem>>, vector<4x16xf32>
    %cst_56 = arith.constant dense<0.000000e+00> : vector<24x16xf32>
    %82 = tpu.matmul %4, %81, %cst_56 {dimension_numbers = #tpu.dot_dimension_numbers<[1], [0], [0], [1], [0, 0, 1, 1], [], []>} : vector<24x4xf32>, vector<4x16xf32>, vector<24x16xf32> -> vector<24x16xf32>
    %83 = arith.addf %80, %82 : vector<24x16xf32>
    %c160 = arith.constant 160 : index
    %c0_57 = arith.constant 0 : index
    %84 = vector.load %arg2[%c160, %c0_57] : memref<312x48xf32, #tpu.memory_space<vmem>>, vector<1x16xf32>
    %85 = vector.broadcast %84 : vector<1x16xf32> to vector<24x16xf32>
    %86 = arith.addf %83, %85 : vector<24x16xf32>
    %cst_58 = arith.constant 0.000000e+00 : f32
    %87 = vector.broadcast %cst_58 : f32 to vector<24x16xf32>
    %88 = arith.maximumf %86, %87 : vector<24x16xf32>
    %c168 = arith.constant 168 : index
    %c0_59 = arith.constant 0 : index
    %89 = vector.load %arg2[%c168, %c0_59] : memref<312x48xf32, #tpu.memory_space<vmem>>, vector<16x4xf32>
    %cst_60 = arith.constant dense<0.000000e+00> : vector<24x4xf32>
    %90 = tpu.matmul %88, %89, %cst_60 {dimension_numbers = #tpu.dot_dimension_numbers<[1], [0], [0], [1], [0, 0, 1, 1], [], []>} : vector<24x16xf32>, vector<16x4xf32>, vector<24x4xf32> -> vector<24x4xf32>
    %c184 = arith.constant 184 : index
    %c0_61 = arith.constant 0 : index
    %91 = vector.load %arg2[%c184, %c0_61] : memref<312x48xf32, #tpu.memory_space<vmem>>, vector<1x4xf32>
    %92 = vector.broadcast %91 : vector<1x4xf32> to vector<24x4xf32>
    %93 = arith.addf %90, %92 : vector<24x4xf32>
    %c64_62 = arith.constant 64 : index
    %c0_63 = arith.constant 0 : index
    %94 = vector.load %arg1[%c64_62, %c0_63] : memref<80x26xf32, #tpu.memory_space<vmem>>, vector<8x26xf32>
    %c192 = arith.constant 192 : index
    %c0_64 = arith.constant 0 : index
    %95 = vector.load %arg2[%c192, %c0_64] : memref<312x48xf32, #tpu.memory_space<vmem>>, vector<4x16xf32>
    %cst_65 = arith.constant dense<0.000000e+00> : vector<24x16xf32>
    %96 = tpu.matmul %93, %95, %cst_65 {dimension_numbers = #tpu.dot_dimension_numbers<[1], [0], [0], [1], [0, 0, 1, 1], [], []>} : vector<24x4xf32>, vector<4x16xf32>, vector<24x16xf32> -> vector<24x16xf32>
    %97 = tpu.concatenate %96, %76 in 0 : vector<24x16xf32>, vector<2x16xf32> -> vector<26x16xf32>
    %cst_66 = arith.constant dense<0.000000e+00> : vector<8x16xf32>
    %98 = tpu.matmul %94, %97, %cst_66 {dimension_numbers = #tpu.dot_dimension_numbers<[1], [0], [0], [1], [0, 0, 1, 1], [], []>} : vector<8x26xf32>, vector<26x16xf32>, vector<8x16xf32> -> vector<8x16xf32>
    %99 = arith.addf %74, %98 : vector<8x16xf32>
    %c200 = arith.constant 200 : index
    %c0_67 = arith.constant 0 : index
    %100 = vector.load %arg2[%c200, %c0_67] : memref<312x48xf32, #tpu.memory_space<vmem>>, vector<1x16xf32>
    %101 = vector.broadcast %100 : vector<1x16xf32> to vector<8x16xf32>
    %102 = arith.addf %99, %101 : vector<8x16xf32>
    %cst_68 = arith.constant 0.000000e+00 : f32
    %103 = vector.broadcast %cst_68 : f32 to vector<8x16xf32>
    %104 = arith.maximumf %102, %103 : vector<8x16xf32>
    %c208 = arith.constant 208 : index
    %c0_69 = arith.constant 0 : index
    %105 = vector.load %arg2[%c208, %c0_69] : memref<312x48xf32, #tpu.memory_space<vmem>>, vector<16x4xf32>
    %cst_70 = arith.constant dense<0.000000e+00> : vector<8x4xf32>
    %106 = tpu.matmul %104, %105, %cst_70 {dimension_numbers = #tpu.dot_dimension_numbers<[1], [0], [0], [1], [0, 0, 1, 1], [], []>} : vector<8x16xf32>, vector<16x4xf32>, vector<8x4xf32> -> vector<8x4xf32>
    %c224 = arith.constant 224 : index
    %c0_71 = arith.constant 0 : index
    %107 = vector.load %arg2[%c224, %c0_71] : memref<312x48xf32, #tpu.memory_space<vmem>>, vector<1x4xf32>
    %108 = vector.broadcast %107 : vector<1x4xf32> to vector<8x4xf32>
    %109 = arith.addf %106, %108 : vector<8x4xf32>
    %c72_72 = arith.constant 72 : index
    %c0_73 = arith.constant 0 : index
    %110 = vector.load %arg1[%c72_72, %c0_73] : memref<80x26xf32, #tpu.memory_space<vmem>>, vector<2x8xf32>
    %cst_74 = arith.constant dense<0.000000e+00> : vector<2x4xf32>
    %111 = tpu.matmul %110, %109, %cst_74 {dimension_numbers = #tpu.dot_dimension_numbers<[1], [0], [0], [1], [0, 0, 1, 1], [], []>} : vector<2x8xf32>, vector<8x4xf32>, vector<2x4xf32> -> vector<2x4xf32>
    %c232 = arith.constant 232 : index
    %c0_75 = arith.constant 0 : index
    %112 = vector.load %arg2[%c232, %c0_75] : memref<312x48xf32, #tpu.memory_space<vmem>>, vector<4x16xf32>
    %cst_76 = arith.constant dense<0.000000e+00> : vector<2x16xf32>
    %113 = tpu.matmul %111, %112, %cst_76 {dimension_numbers = #tpu.dot_dimension_numbers<[1], [0], [0], [1], [0, 0, 1, 1], [], []>} : vector<2x4xf32>, vector<4x16xf32>, vector<2x16xf32> -> vector<2x16xf32>
    %114 = arith.addf %113, %77 : vector<2x16xf32>
    %c240 = arith.constant 240 : index
    %c0_77 = arith.constant 0 : index
    %115 = vector.load %arg2[%c240, %c0_77] : memref<312x48xf32, #tpu.memory_space<vmem>>, vector<1x16xf32>
    %116 = vector.broadcast %115 : vector<1x16xf32> to vector<2x16xf32>
    %117 = arith.addf %114, %116 : vector<2x16xf32>
    %cst_78 = arith.constant 0.000000e+00 : f32
    %118 = vector.broadcast %cst_78 : f32 to vector<2x16xf32>
    %119 = arith.maximumf %117, %118 : vector<2x16xf32>
    %c248 = arith.constant 248 : index
    %c0_79 = arith.constant 0 : index
    %120 = vector.load %arg2[%c248, %c0_79] : memref<312x48xf32, #tpu.memory_space<vmem>>, vector<16x4xf32>
    %cst_80 = arith.constant dense<0.000000e+00> : vector<2x4xf32>
    %121 = tpu.matmul %119, %120, %cst_80 {dimension_numbers = #tpu.dot_dimension_numbers<[1], [0], [0], [1], [0, 0, 1, 1], [], []>} : vector<2x16xf32>, vector<16x4xf32>, vector<2x4xf32> -> vector<2x4xf32>
    %c264 = arith.constant 264 : index
    %c0_81 = arith.constant 0 : index
    %122 = vector.load %arg2[%c264, %c0_81] : memref<312x48xf32, #tpu.memory_space<vmem>>, vector<1x4xf32>
    %123 = vector.broadcast %122 : vector<1x4xf32> to vector<2x4xf32>
    %124 = arith.addf %121, %123 : vector<2x4xf32>
    %cst_82 = arith.constant dense<0.000000e+00> : vector<2x16xf32>
    %125 = tpu.matmul %124, %6, %cst_82 {dimension_numbers = #tpu.dot_dimension_numbers<[1], [0], [0], [1], [0, 0, 1, 1], [], []>} : vector<2x4xf32>, vector<4x16xf32>, vector<2x16xf32> -> vector<2x16xf32>
    %126 = vector.broadcast %7 : vector<1x16xf32> to vector<2x16xf32>
    %127 = arith.addf %125, %126 : vector<2x16xf32>
    %cst_83 = arith.constant 0.000000e+00 : f32
    %128 = vector.broadcast %cst_83 : f32 to vector<2x16xf32>
    %129 = arith.maximumf %127, %128 : vector<2x16xf32>
    %cst_84 = arith.constant dense<0.000000e+00> : vector<2x8xf32>
    %130 = tpu.matmul %129, %8, %cst_84 {dimension_numbers = #tpu.dot_dimension_numbers<[1], [0], [0], [1], [0, 0, 1, 1], [], []>} : vector<2x16xf32>, vector<16x8xf32>, vector<2x8xf32> -> vector<2x8xf32>
    %131 = vector.broadcast %9 : vector<1x8xf32> to vector<2x8xf32>
    %132 = arith.addf %130, %131 : vector<2x8xf32>
    %c0_85 = arith.constant 0 : index
    %c0_86 = arith.constant 0 : index
    %133 = vector.load %arg2[%c0_85, %c0_86] : memref<312x48xf32, #tpu.memory_space<vmem>>, vector<4x48xf32>
    %cst_87 = arith.constant dense<0.000000e+00> : vector<8x48xf32>
    %134 = tpu.matmul %51, %133, %cst_87 {dimension_numbers = #tpu.dot_dimension_numbers<[1], [0], [0], [1], [0, 0, 1, 1], [], []>} : vector<8x4xf32>, vector<4x48xf32>, vector<8x48xf32> -> vector<8x48xf32>
    %c8_88 = arith.constant 8 : index
    %c0_89 = arith.constant 0 : index
    %135 = vector.load %arg2[%c8_88, %c0_89] : memref<312x48xf32, #tpu.memory_space<vmem>>, vector<4x48xf32>
    %cst_90 = arith.constant dense<0.000000e+00> : vector<2x48xf32>
    %136 = tpu.matmul %66, %135, %cst_90 {dimension_numbers = #tpu.dot_dimension_numbers<[1], [0], [0], [1], [0, 0, 1, 1], [], []>} : vector<2x4xf32>, vector<4x48xf32>, vector<2x48xf32> -> vector<2x48xf32>
    %137 = vector.extract_strided_slice %134 {offsets = [0, 0], sizes = [8, 16], strides = [1, 1]} : vector<8x48xf32> to vector<8x16xf32>
    %138 = vector.extract_strided_slice %134 {offsets = [0, 16], sizes = [8, 16], strides = [1, 1]} : vector<8x48xf32> to vector<8x16xf32>
    %139 = vector.extract_strided_slice %134 {offsets = [0, 32], sizes = [8, 16], strides = [1, 1]} : vector<8x48xf32> to vector<8x16xf32>
    %140 = vector.extract_strided_slice %136 {offsets = [0, 0], sizes = [2, 16], strides = [1, 1]} : vector<2x48xf32> to vector<2x16xf32>
    %141 = vector.extract_strided_slice %136 {offsets = [0, 16], sizes = [2, 16], strides = [1, 1]} : vector<2x48xf32> to vector<2x16xf32>
    %142 = vector.extract_strided_slice %136 {offsets = [0, 32], sizes = [2, 16], strides = [1, 1]} : vector<2x48xf32> to vector<2x16xf32>
    %c0_91 = arith.constant 0 : index
    %c0_92 = arith.constant 0 : index
    %143 = vector.load %arg1[%c0_91, %c0_92] : memref<80x26xf32, #tpu.memory_space<vmem>>, vector<24x18xf32>
    %144 = tpu.concatenate %137, %138, %140 in 0 : vector<8x16xf32>, vector<8x16xf32>, vector<2x16xf32> -> vector<18x16xf32>
    %cst_93 = arith.constant dense<0.000000e+00> : vector<24x16xf32>
    %145 = tpu.matmul %143, %144, %cst_93 {dimension_numbers = #tpu.dot_dimension_numbers<[1], [0], [0], [1], [0, 0, 1, 1], [], []>} : vector<24x18xf32>, vector<18x16xf32>, vector<24x16xf32> -> vector<24x16xf32>
    %c16_94 = arith.constant 16 : index
    %c0_95 = arith.constant 0 : index
    %146 = vector.load %arg2[%c16_94, %c0_95] : memref<312x48xf32, #tpu.memory_space<vmem>>, vector<4x16xf32>
    %cst_96 = arith.constant dense<0.000000e+00> : vector<24x16xf32>
    %147 = tpu.matmul %35, %146, %cst_96 {dimension_numbers = #tpu.dot_dimension_numbers<[1], [0], [0], [1], [0, 0, 1, 1], [], []>} : vector<24x4xf32>, vector<4x16xf32>, vector<24x16xf32> -> vector<24x16xf32>
    %148 = arith.addf %145, %147 : vector<24x16xf32>
    %c24_97 = arith.constant 24 : index
    %c0_98 = arith.constant 0 : index
    %149 = vector.load %arg2[%c24_97, %c0_98] : memref<312x48xf32, #tpu.memory_space<vmem>>, vector<1x16xf32>
    %150 = vector.broadcast %149 : vector<1x16xf32> to vector<24x16xf32>
    %151 = arith.addf %148, %150 : vector<24x16xf32>
    %cst_99 = arith.constant 0.000000e+00 : f32
    %152 = vector.broadcast %cst_99 : f32 to vector<24x16xf32>
    %153 = arith.maximumf %151, %152 : vector<24x16xf32>
    %c32_100 = arith.constant 32 : index
    %c0_101 = arith.constant 0 : index
    %154 = vector.load %arg2[%c32_100, %c0_101] : memref<312x48xf32, #tpu.memory_space<vmem>>, vector<16x4xf32>
    %cst_102 = arith.constant dense<0.000000e+00> : vector<24x4xf32>
    %155 = tpu.matmul %153, %154, %cst_102 {dimension_numbers = #tpu.dot_dimension_numbers<[1], [0], [0], [1], [0, 0, 1, 1], [], []>} : vector<24x16xf32>, vector<16x4xf32>, vector<24x4xf32> -> vector<24x4xf32>
    %c48_103 = arith.constant 48 : index
    %c0_104 = arith.constant 0 : index
    %156 = vector.load %arg2[%c48_103, %c0_104] : memref<312x48xf32, #tpu.memory_space<vmem>>, vector<1x4xf32>
    %157 = vector.broadcast %156 : vector<1x4xf32> to vector<24x4xf32>
    %158 = arith.addf %155, %157 : vector<24x4xf32>
    %c24_105 = arith.constant 24 : index
    %c0_106 = arith.constant 0 : index
    %159 = vector.load %arg1[%c24_105, %c0_106] : memref<80x26xf32, #tpu.memory_space<vmem>>, vector<8x26xf32>
    %c56_107 = arith.constant 56 : index
    %c0_108 = arith.constant 0 : index
    %160 = vector.load %arg2[%c56_107, %c0_108] : memref<312x48xf32, #tpu.memory_space<vmem>>, vector<4x16xf32>
    %cst_109 = arith.constant dense<0.000000e+00> : vector<24x16xf32>
    %161 = tpu.matmul %158, %160, %cst_109 {dimension_numbers = #tpu.dot_dimension_numbers<[1], [0], [0], [1], [0, 0, 1, 1], [], []>} : vector<24x4xf32>, vector<4x16xf32>, vector<24x16xf32> -> vector<24x16xf32>
    %162 = tpu.concatenate %161, %141 in 0 : vector<24x16xf32>, vector<2x16xf32> -> vector<26x16xf32>
    %cst_110 = arith.constant dense<0.000000e+00> : vector<8x16xf32>
    %163 = tpu.matmul %159, %162, %cst_110 {dimension_numbers = #tpu.dot_dimension_numbers<[1], [0], [0], [1], [0, 0, 1, 1], [], []>} : vector<8x26xf32>, vector<26x16xf32>, vector<8x16xf32> -> vector<8x16xf32>
    %164 = arith.addf %139, %163 : vector<8x16xf32>
    %c64_111 = arith.constant 64 : index
    %c0_112 = arith.constant 0 : index
    %165 = vector.load %arg2[%c64_111, %c0_112] : memref<312x48xf32, #tpu.memory_space<vmem>>, vector<1x16xf32>
    %166 = vector.broadcast %165 : vector<1x16xf32> to vector<8x16xf32>
    %167 = arith.addf %164, %166 : vector<8x16xf32>
    %cst_113 = arith.constant 0.000000e+00 : f32
    %168 = vector.broadcast %cst_113 : f32 to vector<8x16xf32>
    %169 = arith.maximumf %167, %168 : vector<8x16xf32>
    %c72_114 = arith.constant 72 : index
    %c0_115 = arith.constant 0 : index
    %170 = vector.load %arg2[%c72_114, %c0_115] : memref<312x48xf32, #tpu.memory_space<vmem>>, vector<16x4xf32>
    %cst_116 = arith.constant dense<0.000000e+00> : vector<8x4xf32>
    %171 = tpu.matmul %169, %170, %cst_116 {dimension_numbers = #tpu.dot_dimension_numbers<[1], [0], [0], [1], [0, 0, 1, 1], [], []>} : vector<8x16xf32>, vector<16x4xf32>, vector<8x4xf32> -> vector<8x4xf32>
    %c88_117 = arith.constant 88 : index
    %c0_118 = arith.constant 0 : index
    %172 = vector.load %arg2[%c88_117, %c0_118] : memref<312x48xf32, #tpu.memory_space<vmem>>, vector<1x4xf32>
    %173 = vector.broadcast %172 : vector<1x4xf32> to vector<8x4xf32>
    %174 = arith.addf %171, %173 : vector<8x4xf32>
    %c32_119 = arith.constant 32 : index
    %c0_120 = arith.constant 0 : index
    %175 = vector.load %arg1[%c32_119, %c0_120] : memref<80x26xf32, #tpu.memory_space<vmem>>, vector<2x8xf32>
    %cst_121 = arith.constant dense<0.000000e+00> : vector<2x4xf32>
    %176 = tpu.matmul %175, %174, %cst_121 {dimension_numbers = #tpu.dot_dimension_numbers<[1], [0], [0], [1], [0, 0, 1, 1], [], []>} : vector<2x8xf32>, vector<8x4xf32>, vector<2x4xf32> -> vector<2x4xf32>
    %c96_122 = arith.constant 96 : index
    %c0_123 = arith.constant 0 : index
    %177 = vector.load %arg2[%c96_122, %c0_123] : memref<312x48xf32, #tpu.memory_space<vmem>>, vector<4x16xf32>
    %cst_124 = arith.constant dense<0.000000e+00> : vector<2x16xf32>
    %178 = tpu.matmul %176, %177, %cst_124 {dimension_numbers = #tpu.dot_dimension_numbers<[1], [0], [0], [1], [0, 0, 1, 1], [], []>} : vector<2x4xf32>, vector<4x16xf32>, vector<2x16xf32> -> vector<2x16xf32>
    %179 = arith.addf %178, %142 : vector<2x16xf32>
    %c104_125 = arith.constant 104 : index
    %c0_126 = arith.constant 0 : index
    %180 = vector.load %arg2[%c104_125, %c0_126] : memref<312x48xf32, #tpu.memory_space<vmem>>, vector<1x16xf32>
    %181 = vector.broadcast %180 : vector<1x16xf32> to vector<2x16xf32>
    %182 = arith.addf %179, %181 : vector<2x16xf32>
    %cst_127 = arith.constant 0.000000e+00 : f32
    %183 = vector.broadcast %cst_127 : f32 to vector<2x16xf32>
    %184 = arith.maximumf %182, %183 : vector<2x16xf32>
    %c112_128 = arith.constant 112 : index
    %c0_129 = arith.constant 0 : index
    %185 = vector.load %arg2[%c112_128, %c0_129] : memref<312x48xf32, #tpu.memory_space<vmem>>, vector<16x4xf32>
    %cst_130 = arith.constant dense<0.000000e+00> : vector<2x4xf32>
    %186 = tpu.matmul %184, %185, %cst_130 {dimension_numbers = #tpu.dot_dimension_numbers<[1], [0], [0], [1], [0, 0, 1, 1], [], []>} : vector<2x16xf32>, vector<16x4xf32>, vector<2x4xf32> -> vector<2x4xf32>
    %c128_131 = arith.constant 128 : index
    %c0_132 = arith.constant 0 : index
    %187 = vector.load %arg2[%c128_131, %c0_132] : memref<312x48xf32, #tpu.memory_space<vmem>>, vector<1x4xf32>
    %188 = vector.broadcast %187 : vector<1x4xf32> to vector<2x4xf32>
    %189 = arith.addf %186, %188 : vector<2x4xf32>
    %190 = tpu.concatenate %124, %189 in 1 : vector<2x4xf32>, vector<2x4xf32> -> vector<2x8xf32>
    %c136_133 = arith.constant 136 : index
    %c0_134 = arith.constant 0 : index
    %191 = vector.load %arg2[%c136_133, %c0_134] : memref<312x48xf32, #tpu.memory_space<vmem>>, vector<4x48xf32>
    %cst_135 = arith.constant dense<0.000000e+00> : vector<8x48xf32>
    %192 = tpu.matmul %109, %191, %cst_135 {dimension_numbers = #tpu.dot_dimension_numbers<[1], [0], [0], [1], [0, 0, 1, 1], [], []>} : vector<8x4xf32>, vector<4x48xf32>, vector<8x48xf32> -> vector<8x48xf32>
    %c144_136 = arith.constant 144 : index
    %c0_137 = arith.constant 0 : index
    %193 = vector.load %arg2[%c144_136, %c0_137] : memref<312x48xf32, #tpu.memory_space<vmem>>, vector<8x48xf32>
    %cst_138 = arith.constant dense<0.000000e+00> : vector<2x48xf32>
    %194 = tpu.matmul %190, %193, %cst_138 {dimension_numbers = #tpu.dot_dimension_numbers<[1], [0], [0], [1], [0, 0, 1, 1], [], []>} : vector<2x8xf32>, vector<8x48xf32>, vector<2x48xf32> -> vector<2x48xf32>
    %195 = vector.extract_strided_slice %192 {offsets = [0, 0], sizes = [8, 16], strides = [1, 1]} : vector<8x48xf32> to vector<8x16xf32>
    %196 = vector.extract_strided_slice %192 {offsets = [0, 16], sizes = [8, 16], strides = [1, 1]} : vector<8x48xf32> to vector<8x16xf32>
    %197 = vector.extract_strided_slice %192 {offsets = [0, 32], sizes = [8, 16], strides = [1, 1]} : vector<8x48xf32> to vector<8x16xf32>
    %198 = vector.extract_strided_slice %194 {offsets = [0, 0], sizes = [2, 16], strides = [1, 1]} : vector<2x48xf32> to vector<2x16xf32>
    %199 = vector.extract_strided_slice %194 {offsets = [0, 16], sizes = [2, 16], strides = [1, 1]} : vector<2x48xf32> to vector<2x16xf32>
    %200 = vector.extract_strided_slice %194 {offsets = [0, 32], sizes = [2, 16], strides = [1, 1]} : vector<2x48xf32> to vector<2x16xf32>
    %c40_139 = arith.constant 40 : index
    %c0_140 = arith.constant 0 : index
    %201 = vector.load %arg1[%c40_139, %c0_140] : memref<80x26xf32, #tpu.memory_space<vmem>>, vector<24x18xf32>
    %202 = tpu.concatenate %195, %196, %198 in 0 : vector<8x16xf32>, vector<8x16xf32>, vector<2x16xf32> -> vector<18x16xf32>
    %cst_141 = arith.constant dense<0.000000e+00> : vector<24x16xf32>
    %203 = tpu.matmul %201, %202, %cst_141 {dimension_numbers = #tpu.dot_dimension_numbers<[1], [0], [0], [1], [0, 0, 1, 1], [], []>} : vector<24x18xf32>, vector<18x16xf32>, vector<24x16xf32> -> vector<24x16xf32>
    %c152_142 = arith.constant 152 : index
    %c0_143 = arith.constant 0 : index
    %204 = vector.load %arg2[%c152_142, %c0_143] : memref<312x48xf32, #tpu.memory_space<vmem>>, vector<4x16xf32>
    %cst_144 = arith.constant dense<0.000000e+00> : vector<24x16xf32>
    %205 = tpu.matmul %93, %204, %cst_144 {dimension_numbers = #tpu.dot_dimension_numbers<[1], [0], [0], [1], [0, 0, 1, 1], [], []>} : vector<24x4xf32>, vector<4x16xf32>, vector<24x16xf32> -> vector<24x16xf32>
    %206 = arith.addf %203, %205 : vector<24x16xf32>
    %c160_145 = arith.constant 160 : index
    %c0_146 = arith.constant 0 : index
    %207 = vector.load %arg2[%c160_145, %c0_146] : memref<312x48xf32, #tpu.memory_space<vmem>>, vector<1x16xf32>
    %208 = vector.broadcast %207 : vector<1x16xf32> to vector<24x16xf32>
    %209 = arith.addf %206, %208 : vector<24x16xf32>
    %cst_147 = arith.constant 0.000000e+00 : f32
    %210 = vector.broadcast %cst_147 : f32 to vector<24x16xf32>
    %211 = arith.maximumf %209, %210 : vector<24x16xf32>
    %c168_148 = arith.constant 168 : index
    %c0_149 = arith.constant 0 : index
    %212 = vector.load %arg2[%c168_148, %c0_149] : memref<312x48xf32, #tpu.memory_space<vmem>>, vector<16x4xf32>
    %cst_150 = arith.constant dense<0.000000e+00> : vector<24x4xf32>
    %213 = tpu.matmul %211, %212, %cst_150 {dimension_numbers = #tpu.dot_dimension_numbers<[1], [0], [0], [1], [0, 0, 1, 1], [], []>} : vector<24x16xf32>, vector<16x4xf32>, vector<24x4xf32> -> vector<24x4xf32>
    %c184_151 = arith.constant 184 : index
    %c0_152 = arith.constant 0 : index
    %214 = vector.load %arg2[%c184_151, %c0_152] : memref<312x48xf32, #tpu.memory_space<vmem>>, vector<1x4xf32>
    %215 = vector.broadcast %214 : vector<1x4xf32> to vector<24x4xf32>
    %216 = arith.addf %213, %215 : vector<24x4xf32>
    %c64_153 = arith.constant 64 : index
    %c0_154 = arith.constant 0 : index
    %217 = vector.load %arg1[%c64_153, %c0_154] : memref<80x26xf32, #tpu.memory_space<vmem>>, vector<8x26xf32>
    %c192_155 = arith.constant 192 : index
    %c0_156 = arith.constant 0 : index
    %218 = vector.load %arg2[%c192_155, %c0_156] : memref<312x48xf32, #tpu.memory_space<vmem>>, vector<4x16xf32>
    %cst_157 = arith.constant dense<0.000000e+00> : vector<24x16xf32>
    %219 = tpu.matmul %216, %218, %cst_157 {dimension_numbers = #tpu.dot_dimension_numbers<[1], [0], [0], [1], [0, 0, 1, 1], [], []>} : vector<24x4xf32>, vector<4x16xf32>, vector<24x16xf32> -> vector<24x16xf32>
    %220 = tpu.concatenate %219, %199 in 0 : vector<24x16xf32>, vector<2x16xf32> -> vector<26x16xf32>
    %cst_158 = arith.constant dense<0.000000e+00> : vector<8x16xf32>
    %221 = tpu.matmul %217, %220, %cst_158 {dimension_numbers = #tpu.dot_dimension_numbers<[1], [0], [0], [1], [0, 0, 1, 1], [], []>} : vector<8x26xf32>, vector<26x16xf32>, vector<8x16xf32> -> vector<8x16xf32>
    %222 = arith.addf %197, %221 : vector<8x16xf32>
    %c200_159 = arith.constant 200 : index
    %c0_160 = arith.constant 0 : index
    %223 = vector.load %arg2[%c200_159, %c0_160] : memref<312x48xf32, #tpu.memory_space<vmem>>, vector<1x16xf32>
    %224 = vector.broadcast %223 : vector<1x16xf32> to vector<8x16xf32>
    %225 = arith.addf %222, %224 : vector<8x16xf32>
    %cst_161 = arith.constant 0.000000e+00 : f32
    %226 = vector.broadcast %cst_161 : f32 to vector<8x16xf32>
    %227 = arith.maximumf %225, %226 : vector<8x16xf32>
    %c208_162 = arith.constant 208 : index
    %c0_163 = arith.constant 0 : index
    %228 = vector.load %arg2[%c208_162, %c0_163] : memref<312x48xf32, #tpu.memory_space<vmem>>, vector<16x4xf32>
    %cst_164 = arith.constant dense<0.000000e+00> : vector<8x4xf32>
    %229 = tpu.matmul %227, %228, %cst_164 {dimension_numbers = #tpu.dot_dimension_numbers<[1], [0], [0], [1], [0, 0, 1, 1], [], []>} : vector<8x16xf32>, vector<16x4xf32>, vector<8x4xf32> -> vector<8x4xf32>
    %c224_165 = arith.constant 224 : index
    %c0_166 = arith.constant 0 : index
    %230 = vector.load %arg2[%c224_165, %c0_166] : memref<312x48xf32, #tpu.memory_space<vmem>>, vector<1x4xf32>
    %231 = vector.broadcast %230 : vector<1x4xf32> to vector<8x4xf32>
    %232 = arith.addf %229, %231 : vector<8x4xf32>
    %c72_167 = arith.constant 72 : index
    %c0_168 = arith.constant 0 : index
    %233 = vector.load %arg1[%c72_167, %c0_168] : memref<80x26xf32, #tpu.memory_space<vmem>>, vector<2x8xf32>
    %cst_169 = arith.constant dense<0.000000e+00> : vector<2x4xf32>
    %234 = tpu.matmul %233, %232, %cst_169 {dimension_numbers = #tpu.dot_dimension_numbers<[1], [0], [0], [1], [0, 0, 1, 1], [], []>} : vector<2x8xf32>, vector<8x4xf32>, vector<2x4xf32> -> vector<2x4xf32>
    %c232_170 = arith.constant 232 : index
    %c0_171 = arith.constant 0 : index
    %235 = vector.load %arg2[%c232_170, %c0_171] : memref<312x48xf32, #tpu.memory_space<vmem>>, vector<4x16xf32>
    %cst_172 = arith.constant dense<0.000000e+00> : vector<2x16xf32>
    %236 = tpu.matmul %234, %235, %cst_172 {dimension_numbers = #tpu.dot_dimension_numbers<[1], [0], [0], [1], [0, 0, 1, 1], [], []>} : vector<2x4xf32>, vector<4x16xf32>, vector<2x16xf32> -> vector<2x16xf32>
    %237 = arith.addf %236, %200 : vector<2x16xf32>
    %c240_173 = arith.constant 240 : index
    %c0_174 = arith.constant 0 : index
    %238 = vector.load %arg2[%c240_173, %c0_174] : memref<312x48xf32, #tpu.memory_space<vmem>>, vector<1x16xf32>
    %239 = vector.broadcast %238 : vector<1x16xf32> to vector<2x16xf32>
    %240 = arith.addf %237, %239 : vector<2x16xf32>
    %cst_175 = arith.constant 0.000000e+00 : f32
    %241 = vector.broadcast %cst_175 : f32 to vector<2x16xf32>
    %242 = arith.maximumf %240, %241 : vector<2x16xf32>
    %c248_176 = arith.constant 248 : index
    %c0_177 = arith.constant 0 : index
    %243 = vector.load %arg2[%c248_176, %c0_177] : memref<312x48xf32, #tpu.memory_space<vmem>>, vector<16x4xf32>
    %cst_178 = arith.constant dense<0.000000e+00> : vector<2x4xf32>
    %244 = tpu.matmul %242, %243, %cst_178 {dimension_numbers = #tpu.dot_dimension_numbers<[1], [0], [0], [1], [0, 0, 1, 1], [], []>} : vector<2x16xf32>, vector<16x4xf32>, vector<2x4xf32> -> vector<2x4xf32>
    %c264_179 = arith.constant 264 : index
    %c0_180 = arith.constant 0 : index
    %245 = vector.load %arg2[%c264_179, %c0_180] : memref<312x48xf32, #tpu.memory_space<vmem>>, vector<1x4xf32>
    %246 = vector.broadcast %245 : vector<1x4xf32> to vector<2x4xf32>
    %247 = arith.addf %244, %246 : vector<2x4xf32>
    %cst_181 = arith.constant dense<0.000000e+00> : vector<2x16xf32>
    %248 = tpu.matmul %247, %6, %cst_181 {dimension_numbers = #tpu.dot_dimension_numbers<[1], [0], [0], [1], [0, 0, 1, 1], [], []>} : vector<2x4xf32>, vector<4x16xf32>, vector<2x16xf32> -> vector<2x16xf32>
    %249 = vector.broadcast %7 : vector<1x16xf32> to vector<2x16xf32>
    %250 = arith.addf %248, %249 : vector<2x16xf32>
    %cst_182 = arith.constant 0.000000e+00 : f32
    %251 = vector.broadcast %cst_182 : f32 to vector<2x16xf32>
    %252 = arith.maximumf %250, %251 : vector<2x16xf32>
    %cst_183 = arith.constant dense<0.000000e+00> : vector<2x8xf32>
    %253 = tpu.matmul %252, %8, %cst_183 {dimension_numbers = #tpu.dot_dimension_numbers<[1], [0], [0], [1], [0, 0, 1, 1], [], []>} : vector<2x16xf32>, vector<16x8xf32>, vector<2x8xf32> -> vector<2x8xf32>
    %254 = vector.broadcast %9 : vector<1x8xf32> to vector<2x8xf32>
    %255 = arith.addf %253, %254 : vector<2x8xf32>
    %c0_184 = arith.constant 0 : index
    %c0_185 = arith.constant 0 : index
    %256 = vector.load %arg2[%c0_184, %c0_185] : memref<312x48xf32, #tpu.memory_space<vmem>>, vector<4x48xf32>
    %cst_186 = arith.constant dense<0.000000e+00> : vector<8x48xf32>
    %257 = tpu.matmul %174, %256, %cst_186 {dimension_numbers = #tpu.dot_dimension_numbers<[1], [0], [0], [1], [0, 0, 1, 1], [], []>} : vector<8x4xf32>, vector<4x48xf32>, vector<8x48xf32> -> vector<8x48xf32>
    %c8_187 = arith.constant 8 : index
    %c0_188 = arith.constant 0 : index
    %258 = vector.load %arg2[%c8_187, %c0_188] : memref<312x48xf32, #tpu.memory_space<vmem>>, vector<4x48xf32>
    %cst_189 = arith.constant dense<0.000000e+00> : vector<2x48xf32>
    %259 = tpu.matmul %189, %258, %cst_189 {dimension_numbers = #tpu.dot_dimension_numbers<[1], [0], [0], [1], [0, 0, 1, 1], [], []>} : vector<2x4xf32>, vector<4x48xf32>, vector<2x48xf32> -> vector<2x48xf32>
    %260 = vector.extract_strided_slice %257 {offsets = [0, 0], sizes = [8, 16], strides = [1, 1]} : vector<8x48xf32> to vector<8x16xf32>
    %261 = vector.extract_strided_slice %257 {offsets = [0, 16], sizes = [8, 16], strides = [1, 1]} : vector<8x48xf32> to vector<8x16xf32>
    %262 = vector.extract_strided_slice %257 {offsets = [0, 32], sizes = [8, 16], strides = [1, 1]} : vector<8x48xf32> to vector<8x16xf32>
    %263 = vector.extract_strided_slice %259 {offsets = [0, 0], sizes = [2, 16], strides = [1, 1]} : vector<2x48xf32> to vector<2x16xf32>
    %264 = vector.extract_strided_slice %259 {offsets = [0, 16], sizes = [2, 16], strides = [1, 1]} : vector<2x48xf32> to vector<2x16xf32>
    %265 = vector.extract_strided_slice %259 {offsets = [0, 32], sizes = [2, 16], strides = [1, 1]} : vector<2x48xf32> to vector<2x16xf32>
    %c0_190 = arith.constant 0 : index
    %c0_191 = arith.constant 0 : index
    %266 = vector.load %arg1[%c0_190, %c0_191] : memref<80x26xf32, #tpu.memory_space<vmem>>, vector<24x18xf32>
    %267 = tpu.concatenate %260, %261, %263 in 0 : vector<8x16xf32>, vector<8x16xf32>, vector<2x16xf32> -> vector<18x16xf32>
    %cst_192 = arith.constant dense<0.000000e+00> : vector<24x16xf32>
    %268 = tpu.matmul %266, %267, %cst_192 {dimension_numbers = #tpu.dot_dimension_numbers<[1], [0], [0], [1], [0, 0, 1, 1], [], []>} : vector<24x18xf32>, vector<18x16xf32>, vector<24x16xf32> -> vector<24x16xf32>
    %c16_193 = arith.constant 16 : index
    %c0_194 = arith.constant 0 : index
    %269 = vector.load %arg2[%c16_193, %c0_194] : memref<312x48xf32, #tpu.memory_space<vmem>>, vector<4x16xf32>
    %cst_195 = arith.constant dense<0.000000e+00> : vector<24x16xf32>
    %270 = tpu.matmul %158, %269, %cst_195 {dimension_numbers = #tpu.dot_dimension_numbers<[1], [0], [0], [1], [0, 0, 1, 1], [], []>} : vector<24x4xf32>, vector<4x16xf32>, vector<24x16xf32> -> vector<24x16xf32>
    %271 = arith.addf %268, %270 : vector<24x16xf32>
    %c24_196 = arith.constant 24 : index
    %c0_197 = arith.constant 0 : index
    %272 = vector.load %arg2[%c24_196, %c0_197] : memref<312x48xf32, #tpu.memory_space<vmem>>, vector<1x16xf32>
    %273 = vector.broadcast %272 : vector<1x16xf32> to vector<24x16xf32>
    %274 = arith.addf %271, %273 : vector<24x16xf32>
    %cst_198 = arith.constant 0.000000e+00 : f32
    %275 = vector.broadcast %cst_198 : f32 to vector<24x16xf32>
    %276 = arith.maximumf %274, %275 : vector<24x16xf32>
    %c32_199 = arith.constant 32 : index
    %c0_200 = arith.constant 0 : index
    %277 = vector.load %arg2[%c32_199, %c0_200] : memref<312x48xf32, #tpu.memory_space<vmem>>, vector<16x4xf32>
    %cst_201 = arith.constant dense<0.000000e+00> : vector<24x4xf32>
    %278 = tpu.matmul %276, %277, %cst_201 {dimension_numbers = #tpu.dot_dimension_numbers<[1], [0], [0], [1], [0, 0, 1, 1], [], []>} : vector<24x16xf32>, vector<16x4xf32>, vector<24x4xf32> -> vector<24x4xf32>
    %c48_202 = arith.constant 48 : index
    %c0_203 = arith.constant 0 : index
    %279 = vector.load %arg2[%c48_202, %c0_203] : memref<312x48xf32, #tpu.memory_space<vmem>>, vector<1x4xf32>
    %280 = vector.broadcast %279 : vector<1x4xf32> to vector<24x4xf32>
    %281 = arith.addf %278, %280 : vector<24x4xf32>
    %c24_204 = arith.constant 24 : index
    %c0_205 = arith.constant 0 : index
    %282 = vector.load %arg1[%c24_204, %c0_205] : memref<80x26xf32, #tpu.memory_space<vmem>>, vector<8x26xf32>
    %c56_206 = arith.constant 56 : index
    %c0_207 = arith.constant 0 : index
    %283 = vector.load %arg2[%c56_206, %c0_207] : memref<312x48xf32, #tpu.memory_space<vmem>>, vector<4x16xf32>
    %cst_208 = arith.constant dense<0.000000e+00> : vector<24x16xf32>
    %284 = tpu.matmul %281, %283, %cst_208 {dimension_numbers = #tpu.dot_dimension_numbers<[1], [0], [0], [1], [0, 0, 1, 1], [], []>} : vector<24x4xf32>, vector<4x16xf32>, vector<24x16xf32> -> vector<24x16xf32>
    %285 = tpu.concatenate %284, %264 in 0 : vector<24x16xf32>, vector<2x16xf32> -> vector<26x16xf32>
    %cst_209 = arith.constant dense<0.000000e+00> : vector<8x16xf32>
    %286 = tpu.matmul %282, %285, %cst_209 {dimension_numbers = #tpu.dot_dimension_numbers<[1], [0], [0], [1], [0, 0, 1, 1], [], []>} : vector<8x26xf32>, vector<26x16xf32>, vector<8x16xf32> -> vector<8x16xf32>
    %287 = arith.addf %262, %286 : vector<8x16xf32>
    %c64_210 = arith.constant 64 : index
    %c0_211 = arith.constant 0 : index
    %288 = vector.load %arg2[%c64_210, %c0_211] : memref<312x48xf32, #tpu.memory_space<vmem>>, vector<1x16xf32>
    %289 = vector.broadcast %288 : vector<1x16xf32> to vector<8x16xf32>
    %290 = arith.addf %287, %289 : vector<8x16xf32>
    %cst_212 = arith.constant 0.000000e+00 : f32
    %291 = vector.broadcast %cst_212 : f32 to vector<8x16xf32>
    %292 = arith.maximumf %290, %291 : vector<8x16xf32>
    %c72_213 = arith.constant 72 : index
    %c0_214 = arith.constant 0 : index
    %293 = vector.load %arg2[%c72_213, %c0_214] : memref<312x48xf32, #tpu.memory_space<vmem>>, vector<16x4xf32>
    %cst_215 = arith.constant dense<0.000000e+00> : vector<8x4xf32>
    %294 = tpu.matmul %292, %293, %cst_215 {dimension_numbers = #tpu.dot_dimension_numbers<[1], [0], [0], [1], [0, 0, 1, 1], [], []>} : vector<8x16xf32>, vector<16x4xf32>, vector<8x4xf32> -> vector<8x4xf32>
    %c88_216 = arith.constant 88 : index
    %c0_217 = arith.constant 0 : index
    %295 = vector.load %arg2[%c88_216, %c0_217] : memref<312x48xf32, #tpu.memory_space<vmem>>, vector<1x4xf32>
    %296 = vector.broadcast %295 : vector<1x4xf32> to vector<8x4xf32>
    %297 = arith.addf %294, %296 : vector<8x4xf32>
    %c32_218 = arith.constant 32 : index
    %c0_219 = arith.constant 0 : index
    %298 = vector.load %arg1[%c32_218, %c0_219] : memref<80x26xf32, #tpu.memory_space<vmem>>, vector<2x8xf32>
    %cst_220 = arith.constant dense<0.000000e+00> : vector<2x4xf32>
    %299 = tpu.matmul %298, %297, %cst_220 {dimension_numbers = #tpu.dot_dimension_numbers<[1], [0], [0], [1], [0, 0, 1, 1], [], []>} : vector<2x8xf32>, vector<8x4xf32>, vector<2x4xf32> -> vector<2x4xf32>
    %c96_221 = arith.constant 96 : index
    %c0_222 = arith.constant 0 : index
    %300 = vector.load %arg2[%c96_221, %c0_222] : memref<312x48xf32, #tpu.memory_space<vmem>>, vector<4x16xf32>
    %cst_223 = arith.constant dense<0.000000e+00> : vector<2x16xf32>
    %301 = tpu.matmul %299, %300, %cst_223 {dimension_numbers = #tpu.dot_dimension_numbers<[1], [0], [0], [1], [0, 0, 1, 1], [], []>} : vector<2x4xf32>, vector<4x16xf32>, vector<2x16xf32> -> vector<2x16xf32>
    %302 = arith.addf %301, %265 : vector<2x16xf32>
    %c104_224 = arith.constant 104 : index
    %c0_225 = arith.constant 0 : index
    %303 = vector.load %arg2[%c104_224, %c0_225] : memref<312x48xf32, #tpu.memory_space<vmem>>, vector<1x16xf32>
    %304 = vector.broadcast %303 : vector<1x16xf32> to vector<2x16xf32>
    %305 = arith.addf %302, %304 : vector<2x16xf32>
    %cst_226 = arith.constant 0.000000e+00 : f32
    %306 = vector.broadcast %cst_226 : f32 to vector<2x16xf32>
    %307 = arith.maximumf %305, %306 : vector<2x16xf32>
    %c112_227 = arith.constant 112 : index
    %c0_228 = arith.constant 0 : index
    %308 = vector.load %arg2[%c112_227, %c0_228] : memref<312x48xf32, #tpu.memory_space<vmem>>, vector<16x4xf32>
    %cst_229 = arith.constant dense<0.000000e+00> : vector<2x4xf32>
    %309 = tpu.matmul %307, %308, %cst_229 {dimension_numbers = #tpu.dot_dimension_numbers<[1], [0], [0], [1], [0, 0, 1, 1], [], []>} : vector<2x16xf32>, vector<16x4xf32>, vector<2x4xf32> -> vector<2x4xf32>
    %c128_230 = arith.constant 128 : index
    %c0_231 = arith.constant 0 : index
    %310 = vector.load %arg2[%c128_230, %c0_231] : memref<312x48xf32, #tpu.memory_space<vmem>>, vector<1x4xf32>
    %311 = vector.broadcast %310 : vector<1x4xf32> to vector<2x4xf32>
    %312 = arith.addf %309, %311 : vector<2x4xf32>
    %313 = tpu.concatenate %247, %312 in 1 : vector<2x4xf32>, vector<2x4xf32> -> vector<2x8xf32>
    %c136_232 = arith.constant 136 : index
    %c0_233 = arith.constant 0 : index
    %314 = vector.load %arg2[%c136_232, %c0_233] : memref<312x48xf32, #tpu.memory_space<vmem>>, vector<4x48xf32>
    %cst_234 = arith.constant dense<0.000000e+00> : vector<8x48xf32>
    %315 = tpu.matmul %232, %314, %cst_234 {dimension_numbers = #tpu.dot_dimension_numbers<[1], [0], [0], [1], [0, 0, 1, 1], [], []>} : vector<8x4xf32>, vector<4x48xf32>, vector<8x48xf32> -> vector<8x48xf32>
    %c144_235 = arith.constant 144 : index
    %c0_236 = arith.constant 0 : index
    %316 = vector.load %arg2[%c144_235, %c0_236] : memref<312x48xf32, #tpu.memory_space<vmem>>, vector<8x48xf32>
    %cst_237 = arith.constant dense<0.000000e+00> : vector<2x48xf32>
    %317 = tpu.matmul %313, %316, %cst_237 {dimension_numbers = #tpu.dot_dimension_numbers<[1], [0], [0], [1], [0, 0, 1, 1], [], []>} : vector<2x8xf32>, vector<8x48xf32>, vector<2x48xf32> -> vector<2x48xf32>
    %318 = vector.extract_strided_slice %315 {offsets = [0, 0], sizes = [8, 16], strides = [1, 1]} : vector<8x48xf32> to vector<8x16xf32>
    %319 = vector.extract_strided_slice %315 {offsets = [0, 16], sizes = [8, 16], strides = [1, 1]} : vector<8x48xf32> to vector<8x16xf32>
    %320 = vector.extract_strided_slice %315 {offsets = [0, 32], sizes = [8, 16], strides = [1, 1]} : vector<8x48xf32> to vector<8x16xf32>
    %321 = vector.extract_strided_slice %317 {offsets = [0, 0], sizes = [2, 16], strides = [1, 1]} : vector<2x48xf32> to vector<2x16xf32>
    %322 = vector.extract_strided_slice %317 {offsets = [0, 16], sizes = [2, 16], strides = [1, 1]} : vector<2x48xf32> to vector<2x16xf32>
    %323 = vector.extract_strided_slice %317 {offsets = [0, 32], sizes = [2, 16], strides = [1, 1]} : vector<2x48xf32> to vector<2x16xf32>
    %c40_238 = arith.constant 40 : index
    %c0_239 = arith.constant 0 : index
    %324 = vector.load %arg1[%c40_238, %c0_239] : memref<80x26xf32, #tpu.memory_space<vmem>>, vector<24x18xf32>
    %325 = tpu.concatenate %318, %319, %321 in 0 : vector<8x16xf32>, vector<8x16xf32>, vector<2x16xf32> -> vector<18x16xf32>
    %cst_240 = arith.constant dense<0.000000e+00> : vector<24x16xf32>
    %326 = tpu.matmul %324, %325, %cst_240 {dimension_numbers = #tpu.dot_dimension_numbers<[1], [0], [0], [1], [0, 0, 1, 1], [], []>} : vector<24x18xf32>, vector<18x16xf32>, vector<24x16xf32> -> vector<24x16xf32>
    %c152_241 = arith.constant 152 : index
    %c0_242 = arith.constant 0 : index
    %327 = vector.load %arg2[%c152_241, %c0_242] : memref<312x48xf32, #tpu.memory_space<vmem>>, vector<4x16xf32>
    %cst_243 = arith.constant dense<0.000000e+00> : vector<24x16xf32>
    %328 = tpu.matmul %216, %327, %cst_243 {dimension_numbers = #tpu.dot_dimension_numbers<[1], [0], [0], [1], [0, 0, 1, 1], [], []>} : vector<24x4xf32>, vector<4x16xf32>, vector<24x16xf32> -> vector<24x16xf32>
    %329 = arith.addf %326, %328 : vector<24x16xf32>
    %c160_244 = arith.constant 160 : index
    %c0_245 = arith.constant 0 : index
    %330 = vector.load %arg2[%c160_244, %c0_245] : memref<312x48xf32, #tpu.memory_space<vmem>>, vector<1x16xf32>
    %331 = vector.broadcast %330 : vector<1x16xf32> to vector<24x16xf32>
    %332 = arith.addf %329, %331 : vector<24x16xf32>
    %cst_246 = arith.constant 0.000000e+00 : f32
    %333 = vector.broadcast %cst_246 : f32 to vector<24x16xf32>
    %334 = arith.maximumf %332, %333 : vector<24x16xf32>
    %c168_247 = arith.constant 168 : index
    %c0_248 = arith.constant 0 : index
    %335 = vector.load %arg2[%c168_247, %c0_248] : memref<312x48xf32, #tpu.memory_space<vmem>>, vector<16x4xf32>
    %cst_249 = arith.constant dense<0.000000e+00> : vector<24x4xf32>
    %336 = tpu.matmul %334, %335, %cst_249 {dimension_numbers = #tpu.dot_dimension_numbers<[1], [0], [0], [1], [0, 0, 1, 1], [], []>} : vector<24x16xf32>, vector<16x4xf32>, vector<24x4xf32> -> vector<24x4xf32>
    %c184_250 = arith.constant 184 : index
    %c0_251 = arith.constant 0 : index
    %337 = vector.load %arg2[%c184_250, %c0_251] : memref<312x48xf32, #tpu.memory_space<vmem>>, vector<1x4xf32>
    %338 = vector.broadcast %337 : vector<1x4xf32> to vector<24x4xf32>
    %339 = arith.addf %336, %338 : vector<24x4xf32>
    %c64_252 = arith.constant 64 : index
    %c0_253 = arith.constant 0 : index
    %340 = vector.load %arg1[%c64_252, %c0_253] : memref<80x26xf32, #tpu.memory_space<vmem>>, vector<8x26xf32>
    %c192_254 = arith.constant 192 : index
    %c0_255 = arith.constant 0 : index
    %341 = vector.load %arg2[%c192_254, %c0_255] : memref<312x48xf32, #tpu.memory_space<vmem>>, vector<4x16xf32>
    %cst_256 = arith.constant dense<0.000000e+00> : vector<24x16xf32>
    %342 = tpu.matmul %339, %341, %cst_256 {dimension_numbers = #tpu.dot_dimension_numbers<[1], [0], [0], [1], [0, 0, 1, 1], [], []>} : vector<24x4xf32>, vector<4x16xf32>, vector<24x16xf32> -> vector<24x16xf32>
    %343 = tpu.concatenate %342, %322 in 0 : vector<24x16xf32>, vector<2x16xf32> -> vector<26x16xf32>
    %cst_257 = arith.constant dense<0.000000e+00> : vector<8x16xf32>
    %344 = tpu.matmul %340, %343, %cst_257 {dimension_numbers = #tpu.dot_dimension_numbers<[1], [0], [0], [1], [0, 0, 1, 1], [], []>} : vector<8x26xf32>, vector<26x16xf32>, vector<8x16xf32> -> vector<8x16xf32>
    %345 = arith.addf %320, %344 : vector<8x16xf32>
    %c200_258 = arith.constant 200 : index
    %c0_259 = arith.constant 0 : index
    %346 = vector.load %arg2[%c200_258, %c0_259] : memref<312x48xf32, #tpu.memory_space<vmem>>, vector<1x16xf32>
    %347 = vector.broadcast %346 : vector<1x16xf32> to vector<8x16xf32>
    %348 = arith.addf %345, %347 : vector<8x16xf32>
    %cst_260 = arith.constant 0.000000e+00 : f32
    %349 = vector.broadcast %cst_260 : f32 to vector<8x16xf32>
    %350 = arith.maximumf %348, %349 : vector<8x16xf32>
    %c208_261 = arith.constant 208 : index
    %c0_262 = arith.constant 0 : index
    %351 = vector.load %arg2[%c208_261, %c0_262] : memref<312x48xf32, #tpu.memory_space<vmem>>, vector<16x4xf32>
    %cst_263 = arith.constant dense<0.000000e+00> : vector<8x4xf32>
    %352 = tpu.matmul %350, %351, %cst_263 {dimension_numbers = #tpu.dot_dimension_numbers<[1], [0], [0], [1], [0, 0, 1, 1], [], []>} : vector<8x16xf32>, vector<16x4xf32>, vector<8x4xf32> -> vector<8x4xf32>
    %c224_264 = arith.constant 224 : index
    %c0_265 = arith.constant 0 : index
    %353 = vector.load %arg2[%c224_264, %c0_265] : memref<312x48xf32, #tpu.memory_space<vmem>>, vector<1x4xf32>
    %354 = vector.broadcast %353 : vector<1x4xf32> to vector<8x4xf32>
    %355 = arith.addf %352, %354 : vector<8x4xf32>
    %c72_266 = arith.constant 72 : index
    %c0_267 = arith.constant 0 : index
    %356 = vector.load %arg1[%c72_266, %c0_267] : memref<80x26xf32, #tpu.memory_space<vmem>>, vector<2x8xf32>
    %cst_268 = arith.constant dense<0.000000e+00> : vector<2x4xf32>
    %357 = tpu.matmul %356, %355, %cst_268 {dimension_numbers = #tpu.dot_dimension_numbers<[1], [0], [0], [1], [0, 0, 1, 1], [], []>} : vector<2x8xf32>, vector<8x4xf32>, vector<2x4xf32> -> vector<2x4xf32>
    %c232_269 = arith.constant 232 : index
    %c0_270 = arith.constant 0 : index
    %358 = vector.load %arg2[%c232_269, %c0_270] : memref<312x48xf32, #tpu.memory_space<vmem>>, vector<4x16xf32>
    %cst_271 = arith.constant dense<0.000000e+00> : vector<2x16xf32>
    %359 = tpu.matmul %357, %358, %cst_271 {dimension_numbers = #tpu.dot_dimension_numbers<[1], [0], [0], [1], [0, 0, 1, 1], [], []>} : vector<2x4xf32>, vector<4x16xf32>, vector<2x16xf32> -> vector<2x16xf32>
    %360 = arith.addf %359, %323 : vector<2x16xf32>
    %c240_272 = arith.constant 240 : index
    %c0_273 = arith.constant 0 : index
    %361 = vector.load %arg2[%c240_272, %c0_273] : memref<312x48xf32, #tpu.memory_space<vmem>>, vector<1x16xf32>
    %362 = vector.broadcast %361 : vector<1x16xf32> to vector<2x16xf32>
    %363 = arith.addf %360, %362 : vector<2x16xf32>
    %cst_274 = arith.constant 0.000000e+00 : f32
    %364 = vector.broadcast %cst_274 : f32 to vector<2x16xf32>
    %365 = arith.maximumf %363, %364 : vector<2x16xf32>
    %c248_275 = arith.constant 248 : index
    %c0_276 = arith.constant 0 : index
    %366 = vector.load %arg2[%c248_275, %c0_276] : memref<312x48xf32, #tpu.memory_space<vmem>>, vector<16x4xf32>
    %cst_277 = arith.constant dense<0.000000e+00> : vector<2x4xf32>
    %367 = tpu.matmul %365, %366, %cst_277 {dimension_numbers = #tpu.dot_dimension_numbers<[1], [0], [0], [1], [0, 0, 1, 1], [], []>} : vector<2x16xf32>, vector<16x4xf32>, vector<2x4xf32> -> vector<2x4xf32>
    %c264_278 = arith.constant 264 : index
    %c0_279 = arith.constant 0 : index
    %368 = vector.load %arg2[%c264_278, %c0_279] : memref<312x48xf32, #tpu.memory_space<vmem>>, vector<1x4xf32>
    %369 = vector.broadcast %368 : vector<1x4xf32> to vector<2x4xf32>
    %370 = arith.addf %367, %369 : vector<2x4xf32>
    %cst_280 = arith.constant dense<0.000000e+00> : vector<2x16xf32>
    %371 = tpu.matmul %370, %6, %cst_280 {dimension_numbers = #tpu.dot_dimension_numbers<[1], [0], [0], [1], [0, 0, 1, 1], [], []>} : vector<2x4xf32>, vector<4x16xf32>, vector<2x16xf32> -> vector<2x16xf32>
    %372 = vector.broadcast %7 : vector<1x16xf32> to vector<2x16xf32>
    %373 = arith.addf %371, %372 : vector<2x16xf32>
    %cst_281 = arith.constant 0.000000e+00 : f32
    %374 = vector.broadcast %cst_281 : f32 to vector<2x16xf32>
    %375 = arith.maximumf %373, %374 : vector<2x16xf32>
    %cst_282 = arith.constant dense<0.000000e+00> : vector<2x8xf32>
    %376 = tpu.matmul %375, %8, %cst_282 {dimension_numbers = #tpu.dot_dimension_numbers<[1], [0], [0], [1], [0, 0, 1, 1], [], []>} : vector<2x16xf32>, vector<16x8xf32>, vector<2x8xf32> -> vector<2x8xf32>
    %377 = vector.broadcast %9 : vector<1x8xf32> to vector<2x8xf32>
    %378 = arith.addf %376, %377 : vector<2x8xf32>
    %379 = tpu.concatenate %132, %255, %378 in 1 : vector<2x8xf32>, vector<2x8xf32>, vector<2x8xf32> -> vector<2x24xf32>
    %c0_283 = arith.constant 0 : index
    %c0_284 = arith.constant 0 : index
    %380 = vector.load %arg3[%c0_283, %c0_284] : memref<2x24xf32, #tpu.memory_space<vmem>>, vector<2x24xf32>
    tpu.vector_store %arg3[%c0_283, %c0_284], %379 {strides = array<i32>} : memref<2x24xf32, #tpu.memory_space<vmem>>, vector<2x24xf32>,
    return
  }
}

</mosaic_0001>

<bundles_post_ra>
// kernel: tpu_custom_call.1
= control target key start
LH: loop header
LB: loop body
LE: loop exit
PB: predicated region body
PF: predicated region fallthrough
CT: control target
= control target key end

     0   :  { %vm35_vm0 = vcmask 1043456   ;;  %vm31_vm1 = vcmask 31744   ;;  %s3214_s0 = inlined_call_operand.vmem [shape: f32[80,4], index: 0, kind: input, shape index: {}]   ;;  %s3215_s1 = inlined_call_operand.vmem [shape: f32[80,26], index: 1, kind: input, shape index: {}]   ;;  %s3216_s2 = inlined_call_operand.vmem [shape: f32[312,48], index: 2, kind: input, shape index: {}]   ;;  %s3217_s3 = inlined_call_operand.hbm [shape: f32[2,24], index: 3, kind: output, shape index: {}]  }
   0x1   :  { %v2450_v0 = vld [vmem:[%s3216_s2] sm:$0xf]  ;;  %v2460_v2 = vld [vmem:[%s3216_s2 + $0x8] sm:$0xf] }
   0x2   :  { %v15_v1 = vld [vmem:[%s3214_s0] sm:$0xff]  ;;  %2211 = vmatpush.msk.msra.mxu0 %vm35_vm0, %v2450_v0  ;;  %2213 = vmatpush.msk.msra.mxu1 %vm35_vm0, %v2460_v2 }
   0x3   :  { %v19_v3 = vld [vmem:[%s3214_s0 + $0x20] sm:$0x3]  ;;  %2212 = vmatmul.msk.f32.vlgmr.msra.gmra.mxu0 %vm31_vm1, %v15_v1 }
   0x4   :  { %2214 = vmatmul.msk.f32.vlgmr.msra.gmra.mxu1 %vm31_vm1, %v19_v3 }
   0x5   :  { %8 = vsyncpa [#allocation3], 0  ;;  %vm142_vm2 = vcmask 1041408   ;;  %s2420_s20 = smov 112   ;;  %v2482_v6 = vld [vmem:[%s3216_s2 + $0x10] sm:$0xf] }
   0x6   :  { %2215 = vmatpush.msk.msra.mxu2 %vm35_vm0, %v2482_v6  ;;  %v16_v7 = vld [vmem:[%s3214_s0 + $0x8] sm:$0xff]  ;;  %v17_v8 = vld [vmem:[%s3214_s0 + $0x10] sm:$0xff]  ;;  %v18_v9 = vld [vmem:[%s3214_s0 + $0x18] sm:$0xff]  ;;  %vm132_vm3 = vcmask 146432   ;;  %vm184_vm4 = vcmask 130048   ;;  %vm262_vm5 = vcmask 211968  }
   0x7   :  { %2216 = vmatmul.msk.f32.vlgmr.msra.gmra.mxu2 %vm31_vm1, %v16_v7  ;;  %v2501_v11 = vld [vmem:[%s3215_s1] sm:$0xff]  ;;  %v2509_v13 = vld [vmem:[%s3215_s1 + $0x8] sm:$0xff]  ;;  %v2517_v14 = vld [vmem:[%s3215_s1 + $0x10] sm:$0xff]  ;;  %s2421_s21 = smov 32   ;;  %s2422_s28 = smov 96   ;;  %vm331_vm6 = vcmask 64512  }
   0x8   :  { %3223 = vst [vmem:[#allocation5_spill] sm:$0xff] %v2501_v11  ;;  %v2524_v15 = vld [vmem:[%s3216_s2 + $0x28] sm:$0xff]  ;;  %v2530_v16 = vld [vmem:[%s3216_s2 + $0x20] sm:$0xff]  ;;  %v2536_v18 = vld [vmem:[%s3216_s2 + $0x18] ss:$0 sm:$0xff]  ;;  %s2423_s22 = smov 4  }
   0x9   :  { %3224 = vst [vmem:[#allocation6_spill] sm:$0xff] %v2509_v13  ;;  %208 = vmatpush.msrb.mxu0 %v2524_v15  ;;  %v2547_v33 = vld [vmem:[%s3216_s2 + $0x38] sm:$0xf]  ;;  %v2554_v34 = vld [vmem:[%s3216_s2 + $0x30] ss:$0 sm:$0xff]  ;;  %v2591_v48 = vld [vmem:[%s3216_s2 + $0x48] sm:$0xff] }
   0xa   :  { %3225 = vst [vmem:[#allocation7_spill] sm:$0xff] %v2517_v14  ;;  %2226 = vmatpush.msk.msrb.mxu1 %vm35_vm0, %v2547_v33  ;;  %v2574_v44 = vld [vmem:[%s3215_s1 + $0x18] sm:$0xff]  ;;  %v2382_v46 = vld [vmem:[%s3216_s2 + $0x40] ss:$0 sm:$0xff]  ;;  %v2586_v47 = vld [vmem:[%s3216_s2 + $0x50] sm:$0xff]  ;;  %s2424_s6 = smov 8  }
   0xb   :  { %209 = vmatpush.msrb.mxu0 %v2530_v16  ;;  %3226 = vst [vmem:[#allocation8_spill] sm:$0xff] %v2591_v48  ;;  %v2606_v55 = vld [vmem:[%s3216_s2 + $0x58] ss:$0 sm:$0xff]  ;;  %v2614_v58 = vld [vmem:[%s3215_s1 + $0x20] sm:$0x3]  ;;  %v2636_v62 = vld [vmem:[%s3216_s2 + $0x70] sm:$0xff] }
   0xc   :  { %v2622_v59 = vld [vmem:[%s3216_s2 + $0x60] sm:$0xf]  ;;  %v2630_v61 = vld [vmem:[%s3216_s2 + $0x78] sm:$0xff]  ;;  %v2642_v63 = vld [vmem:[%s3216_s2 + $0x88] sm:$0xf]  ;;  %s2202_s9 = sshll.u32 %s3217_s3, 4  ;;  %s2203_s9 = int_to_ptr.hbm [resolvable:$true] %s2202_s9 }
   0xd   :  { %2234 = vmatpush.msk.msra.mxu1 %vm35_vm0, %v2622_v59  ;;  %3227 = vst [vmem:[#allocation9_spill] sm:$0xff] %v2642_v63  ;;  %v2649_v1 = vld [vmem:[%s3216_s2 + $0x68] ss:$0 sm:$0xff]  ;;  %vm2193_vm7 = vcmask 189440  }
   0xf   :  { %2217 = vmatmul.msk.f32.gmra.mxu2 %vm31_vm1, %v17_v8 }
  0x17   :  { %2218 = vmatmul.msk.f32.gmra.mxu2 %vm31_vm1, %v18_v9  ;;  %v20_v9 = vld [vmem:[%s3214_s0 + $0x28] sm:$0xff] }
  0x80   :  { %v2469_v4 = vpop.f32.mrf.mxu0 }
  0x81   :  { %90 = vrot.lane.b32.xlu0 %v2469_v4, %s2420_s20  ;;  %v2473_v5 = vpop.f32.mrf.mxu1 }
  0x82   :  { %2219 = vmatpush.msk.msra.mxu3 %vm142_vm2, %v2473_v5 }
  0x89   :  { %260 = vrot.lane.b32.xlu0 %v2473_v5, %s2420_s20 }
  0x8a   :  { %v123_v17 = vpop.f32.mrf.mxu2 }
  0x92   :  { %v126_v22 = vpop.f32.mrf.mxu2 }
  0x9a   :  { %v129_v28 = vpop.f32.mrf.mxu2 }
  0xf3   :  { %v91_v10 = vpop.permute.xlu0 %90 }
  0xf4   :  { %160 = vmatpush.msra.mxu3 %v91_v10  ;;  %v2660_v10 = vld [vmem:[%s3216_s2 + $0x80] ss:$0 sm:$0xff] }
  0xf6   :  { %161 = vmatpush.msra.mxu3 %v2469_v4 }
  0xf7   :  { %2220 = vmatmul.msk.f32.vlgmr.msra.gmra.mxu3 %vm132_vm3, %v2501_v11 }
  0xf8   :  { %324 = vmatpush.msrb.mxu3 %v2586_v47 }
  0xfa   :  { %325 = vmatpush.msrb.mxu3 %v2591_v48 }
  0xfb   :  { %v261_v12 = vpop.permute.xlu0 %260 }
  0xfc   :  { %2230 = vmatpush.msk.msrb.mxu2 %vm142_vm2, %v261_v12  ;;  %2237 = vmatpush.msk.msra.mxu3 %vm35_vm0, %v2642_v63 }
  0xff   :  { %2221 = vmatmul.msk.f32.gmra.mxu3 %vm132_vm3, %v2509_v13 }
 0x107   :  { %2222 = vmatmul.msk.f32.gmra.mxu3 %vm132_vm3, %v2517_v14 }
 0x17a   :  { %v163_v19 = vpop.f32.mrf.mxu3 }
 0x17b   :  { %v164_v20 = vadd.f32 %v163_v19, %v123_v17  ;;  %v2670_v19 = vld [vmem:[%s3216_s2 + $0x90] sm:$0xff] }
 0x17d   :  { %v174_v21 = vadd.f32 %v2536_v18, %v164_v20 }
 0x17f   :  { %v177_v23 = vmax.f32 %v174_v21, 0.0  ;;  %v24_v21 = vld [vmem:[%s3214_s0 + $0x48] sm:$0x3] }
 0x181   :  { %2223 = vmatmul.msk.f32.vlgmr.msrb.gmra.mxu0 %vm184_vm4, %v177_v23 }
 0x182   :  { %v166_v24 = vpop.f32.mrf.mxu3 }
 0x183   :  { %v167_v25 = vadd.f32 %v166_v24, %v126_v22  ;;  %v2685_v24 = vld [vmem:[%s3216_s2 + $0x98] sm:$0xf] }
 0x185   :  { %v175_v26 = vadd.f32 %v2536_v18, %v167_v25  ;;  %v21_v25 = vld [vmem:[%s3214_s0 + $0x30] sm:$0xff] }
 0x187   :  { %v178_v27 = vmax.f32 %v175_v26, 0.0  ;;  %v22_v26 = vld [vmem:[%s3214_s0 + $0x38] sm:$0xff] }
 0x189   :  { %2224 = vmatmul.msk.f32.gmra.mxu0 %vm184_vm4, %v178_v27  ;;  %v23_v27 = vld [vmem:[%s3214_s0 + $0x40] sm:$0xff] }
 0x18a   :  { %v169_v29 = vpop.f32.mrf.mxu3 }
 0x18b   :  { %v170_v30 = vadd.f32 %v169_v29, %v129_v28 }
 0x18d   :  { %v176_v31 = vadd.f32 %v2536_v18, %v170_v30  ;;  %v2706_v30 = vld [vmem:[%s3215_s1 + $0x28] sm:$0xff] }
 0x18f   :  { %v179_v32 = vmax.f32 %v176_v31, 0.0  ;;  %v2714_v31 = vld [vmem:[%s3215_s1 + $0x30] sm:$0xff] }
 0x191   :  { %2225 = vmatmul.msk.f32.gmra.mxu0 %vm184_vm4, %v179_v32  ;;  %v2721_v32 = vld [vmem:[%s3215_s1 + $0x38] sm:$0xff] }
 0x1fe   :  { %v211_v35 = vpop.f32.mrf.mxu0 }
 0x1ff   :  { %v2557_v36 = vadd.f32 %v2554_v34, %v211_v35 }
 0x201   :  { %2227 = vmatmul.msk.f32.vlgmr.msrb.gmra.mxu1 %vm31_vm1, %v2557_v36 }
 0x202   :  { %2240 = vmatpush.msk.msrb.mxu1 %vm35_vm0, %v2685_v24 }
 0x206   :  { %v214_v37 = vpop.f32.mrf.mxu0 }
 0x207   :  { %v2562_v38 = vadd.f32 %v2554_v34, %v214_v37  ;;  %v2729_v37 = vld [vmem:[%s3216_s2 + $0xb0] sm:$0xff] }
 0x209   :  { %2228 = vmatmul.msk.f32.gmra.mxu1 %vm31_vm1, %v2562_v38 }
 0x20e   :  { %v217_v39 = vpop.f32.mrf.mxu0 }
 0x20f   :  { %v2567_v40 = vadd.f32 %v2554_v34, %v217_v39  ;;  %v2735_v39 = vld [vmem:[%s3216_s2 + $0xa8] sm:$0xff] }
 0x211   :  { %2229 = vmatmul.msk.f32.gmra.mxu1 %vm31_vm1, %v2567_v40 }
 0x27e   :  { %v251_v41 = vpop.f32.mrf.mxu1 }
 0x286   :  { %v254_v42 = vpop.f32.mrf.mxu1 }
 0x28e   :  { %v257_v43 = vpop.f32.mrf.mxu1 }
 0x28f   :  { %281 = vmatpush.msrb.mxu2 %v257_v43 }
 0x291   :  { %282 = vmatpush.msrb.mxu2 %v254_v42  ;;  %v2741_v42 = vld [vmem:[%s3216_s2 + $0xa0] ss:$0 sm:$0xff] }
 0x293   :  { %283 = vmatpush.msrb.mxu2 %v251_v41 }
 0x294   :  { %2231 = vmatmul.msk.f32.vlgmr.msrb.gmra.mxu2 %vm262_vm5, %v2574_v44 }
 0x295   :  { %410 = vmatpush.msra.mxu2 %v2630_v61 }
 0x297   :  { %411 = vmatpush.msra.mxu2 %v2636_v62 }
 0x317   :  { %v285_v45 = vpop.f32.mrf.mxu2 }
 0x318   :  { %289 = vrot.lane.b32.xlu1 %v285_v45, %s2421_s21 }
 0x320   :  { %296 = vrot.lane.b32.xlu1 %v2382_v46, %s2421_s21 }
 0x38a   :  { %v290_v49 = vpop.permute.xlu1 %289 }
 0x38b   :  { %v292_v50 = vadd.f32 %v290_v49, %v2469_v4 }
 0x392   :  { %v2596_v51 = vpop.permute.xlu1 %296 }
 0x393   :  { %v299_v52 = vadd.f32 %v2596_v51, %v292_v50 }
 0x395   :  { %v300_v53 = vmax.f32 %v299_v52, 0.0 }
 0x397   :  { %306 = vrot.lane.b32.xlu2 %v300_v53, %s2422_s28 }
 0x39f   :  { %356 = vrot.lane.b32.xlu2 %v2473_v5, %s2422_s28 }
 0x3f1   :  { %v307_v54 = vpop.permute.xlu2 %306 }
 0x3f2   :  { %2232 = vmatmul.msk.f32.vlgmr.msrb.gmra.mxu3 %vm184_vm4, %v307_v54 }
 0x3f3   :  { %591 = vmatpush.msrb.mxu3 %v2729_v37 }
 0x3f5   :  { %592 = vmatpush.msrb.mxu3 %v2735_v39 }
 0x3f9   :  { %v357_v3 = vpop.permute.xlu2 %356 }
 0x3fa   :  { %2238 = vmatmul.msk.f32.vlgmr.msra.gmra.mxu3 %vm31_vm1, %v20_v9  ;;  %v2759_v9 = vld [vmem:[%s3216_s2 + $0xb8] ss:$0 sm:$0xff] }
 0x475   :  { %v327_v56 = vpop.f32.mrf.mxu3 }
 0x476   :  { %v2609_v57 = vadd.f32 %v2606_v55, %v327_v56 }
 0x478   :  { %350 = vmatpush.msra.mxu0 %v2609_v57 }
 0x479   :  { %2233 = vmatmul.msk.f32.vlgmr.msra.gmra.mxu0 %vm331_vm6, %v2614_v58 }
 0x47a   :  { %467 = vmatpush.msrb.mxu0 %v2670_v19 }
 0x47d   :  { %v2673_v20 = vpop.f32.mrf.mxu3 }
 0x47e   :  { %476 = vrot.lane.b32.xlu1 %v2673_v20, %s2420_s20 }
 0x4f0   :  { %v477_v29 = vpop.permute.xlu1 %476 }
 0x4f6   :  { %v352_v60 = vpop.f32.mrf.mxu0 }
 0x4f7   :  { %2235 = vmatmul.msk.f32.vlgmr.msra.gmra.mxu1 %vm31_vm1, %v352_v60 }
 0x4ff   :  { %2241 = vmatmul.msk.f32.vlgmr.msrb.gmra.mxu1 %vm31_vm1, %v21_v25 }
 0x507   :  { %2242 = vmatmul.msk.f32.gmra.mxu1 %vm31_vm1, %v22_v26 }
 0x50f   :  { %2243 = vmatmul.msk.f32.gmra.mxu1 %vm31_vm1, %v23_v27 }
 0x574   :  { %v382_v4 = vpop.f32.mrf.mxu1 }
 0x575   :  { %v383_v5 = vadd.f32 %v382_v4, %v357_v3 }
 0x577   :  { %v387_v7 = vadd.f32 %v2649_v1, %v383_v5 }
 0x579   :  { %v388_v8 = vmax.f32 %v387_v7, 0.0 }
 0x57b   :  { %2236 = vmatmul.msk.f32.vlgmr.msra.gmra.mxu2 %vm184_vm4, %v388_v8  ;;  %v2752_v8 = vld [vmem:[%s3216_s2 + $0xc0] sm:$0xf] }
 0x57c   :  { %v509_v41 = vpop.f32.mrf.mxu1  ;;  %2251 = vmatpush.msk.msra.mxu0 %vm35_vm0, %v2752_v8 }
 0x584   :  { %v512_v49 = vpop.f32.mrf.mxu1 }
 0x58c   :  { %v515_v60 = vpop.f32.mrf.mxu1 }
 0x5fe   :  { %v413_v12 = vpop.f32.mrf.mxu2 }
 0x5ff   :  { %v2663_v17 = vadd.f32 %v2660_v10, %v413_v12 }
 0x601   :  { %417 = vrot.lane.b32.xlu0 %v2663_v17, %s2423_s22 }
 0x673   :  { %v418_v22 = vpop.permute.xlu0 %417 }
 0x674   :  { %v420_v23 = vsel %vm31_vm1, %v24_v21, %v418_v22 }
 0x675   :  { %2239 = vmatmul.msk.f32.vlgmr.msrb.gmra.mxu0 %vm331_vm6, %v420_v23 }
 0x6f2   :  { %v469_v28 = vpop.f32.mrf.mxu0 }
 0x6f3   :  { %643 = vrot.lane.b32.xlu2 %v469_v28, %s2420_s20  ;;  %2244 = vmatpush.msk.msrb.mxu2 %vm142_vm2, %v469_v28 }
 0x6f5   :  { %544 = vmatpush.msrb.mxu2 %v477_v29 }
 0x6f7   :  { %545 = vmatpush.msrb.mxu2 %v2673_v20 }
 0x6f8   :  { %2245 = vmatmul.msk.f32.vlgmr.msrb.gmra.mxu2 %vm132_vm3, %v2706_v30 }
 0x700   :  { %2246 = vmatmul.msk.f32.gmra.mxu2 %vm132_vm3, %v2714_v31 }
 0x708   :  { %2247 = vmatmul.msk.f32.gmra.mxu2 %vm132_vm3, %v2721_v32 }
 0x74d   :  { %v644_v35 = vpop.permute.xlu2 %643 }
 0x74e   :  { %2255 = vmatpush.msk.msra.mxu1 %vm142_vm2, %v644_v35 }
 0x77b   :  { %v547_v43 = vpop.f32.mrf.mxu2 }
 0x77c   :  { %v548_v45 = vadd.f32 %v547_v43, %v509_v41  ;;  %v2779_v41 = vld [vmem:[%s3215_s1 + $0x40] sm:$0xff]  ;;  %v2388_v43 = vld [vmem:[%s3216_s2 + $0xc8] ss:$0 sm:$0xff] }
 0x77d   :  { %678 = vrot.lane.b32.xlu1 %v2388_v43, %s2421_s21 }
 0x77e   :  { %v558_v46 = vadd.f32 %v2741_v42, %v548_v45 }
 0x780   :  { %v561_v50 = vmax.f32 %v558_v46, 0.0  ;;  %v2792_v46 = vld [vmem:[%s3216_s2 + $0xd8] sm:$0xff] }
 0x781   :  { %706 = vmatpush.msra.mxu2 %v2792_v46 }
 0x782   :  { %2248 = vmatmul.msk.f32.vlgmr.msrb.gmra.mxu3 %vm184_vm4, %v561_v50 }
 0x783   :  { %v550_v52 = vpop.f32.mrf.mxu2 }
 0x784   :  { %v551_v53 = vadd.f32 %v550_v52, %v512_v49  ;;  %v2797_v49 = vld [vmem:[%s3216_s2 + $0xd0] sm:$0xff] }
 0x785   :  { %707 = vmatpush.msra.mxu2 %v2797_v49 }
 0x786   :  { %v559_v54 = vadd.f32 %v2741_v42, %v551_v53 }
 0x788   :  { %v562_v56 = vmax.f32 %v559_v54, 0.0 }
 0x78a   :  { %2249 = vmatmul.msk.f32.gmra.mxu3 %vm184_vm4, %v562_v56 }
 0x78b   :  { %v553_v3 = vpop.f32.mrf.mxu2 }
 0x78c   :  { %v554_v4 = vadd.f32 %v553_v3, %v515_v60  ;;  %v2810_v60 = vld [vmem:[%s3216_s2 + $0xe0] ss:$0 sm:$0xff] }
 0x78e   :  { %v560_v5 = vadd.f32 %v2741_v42, %v554_v4 }
 0x790   :  { %v563_v7 = vmax.f32 %v560_v5, 0.0  ;;  %v2826_v5 = vld [vmem:[%s3216_s2 + $0xe8] sm:$0xf] }
 0x791   :  { %2259 = vmatpush.msk.msrb.mxu0 %vm35_vm0, %v2826_v5 }
 0x792   :  { %2250 = vmatmul.msk.f32.gmra.mxu3 %vm184_vm4, %v563_v7 }
 0x7ef   :  { %v2801_v52 = vpop.permute.xlu1 %678 }
 0x805   :  { %v594_v12 = vpop.f32.mrf.mxu3 }
 0x806   :  { %v2762_v21 = vadd.f32 %v2759_v9, %v594_v12  ;;  %v2840_v12 = vld [vmem:[%s3216_s2 + $0x100] sm:$0xff] }
 0x808   :  { %2252 = vmatmul.msk.f32.vlgmr.msra.gmra.mxu0 %vm31_vm1, %v2762_v21 }
 0x809   :  { %2265 = vmatpush.msk.msra.mxu0 %vm35_vm0, %v2450_v0 }
 0x80d   :  { %v597_v22 = vpop.f32.mrf.mxu3 }
 0x80e   :  { %v2767_v23 = vadd.f32 %v2759_v9, %v597_v22  ;;  %v2846_v22 = vld [vmem:[%s3216_s2 + $0xf8] sm:$0xff] }
 0x810   :  { %2253 = vmatmul.msk.f32.gmra.mxu0 %vm31_vm1, %v2767_v23 }
 0x815   :  { %v600_v25 = vpop.f32.mrf.mxu3 }
 0x816   :  { %v2772_v26 = vadd.f32 %v2759_v9, %v600_v25 }
 0x818   :  { %2254 = vmatmul.msk.f32.gmra.mxu0 %vm31_vm1, %v2772_v26 }
 0x885   :  { %v634_v27 = vpop.f32.mrf.mxu0 }
 0x88d   :  { %v637_v29 = vpop.f32.mrf.mxu0 }
 0x895   :  { %v640_v35 = vpop.f32.mrf.mxu0 }
 0x896   :  { %663 = vmatpush.msra.mxu1 %v640_v35 }
 0x898   :  { %664 = vmatpush.msra.mxu1 %v637_v29 }
 0x89a   :  { %665 = vmatpush.msra.mxu1 %v634_v27 }
 0x89b   :  { %2256 = vmatmul.msk.f32.vlgmr.msra.gmra.mxu1 %vm262_vm5, %v2779_v41 }
 0x89c   :  { %791 = vmatpush.msrb.mxu1 %v2840_v12 }
 0x89e   :  { %792 = vmatpush.msrb.mxu1 %v2846_v22 }
 0x8a0   :  { %2267 = vmatpush.msk.msra.mxu1 %vm35_vm0, %v2460_v2 }
 0x918   :  { %v667_v45 = vpop.f32.mrf.mxu1 }
 0x919   :  { %671 = vrot.lane.b32.xlu0 %v667_v45, %s2421_s21 }
 0x921   :  { %737 = vrot.lane.b32.xlu0 %v469_v28, %s2422_s28 }
 0x98b   :  { %v672_v50 = vpop.permute.xlu0 %671 }
 0x98c   :  { %v674_v53 = vadd.f32 %v672_v50, %v2673_v20  ;;  %v2818_v20 = vld [vmem:[%s3215_s1 + $0x48] sm:$0x3]  ;;  %v2871_v50 = vld [vmem:[%s3216_s2 + $0x110] sm:$0xf] }
 0x98d   :  { %2262 = vmatpush.msk.msrb.mxu2 %vm35_vm0, %v2871_v50 }
 0x98e   :  { %v681_v28 = vadd.f32 %v2801_v52, %v674_v53  ;;  %v2878_v53 = vld [vmem:[%s3216_s2 + $0x128] sm:$0xff] }
 0x990   :  { %v682_v54 = vmax.f32 %v681_v28, 0.0  ;;  %v2892_v28 = vld [vmem:[%s3216_s2 + $0x108] ss:$0 sm:$0xff] }
 0x992   :  { %688 = vrot.lane.b32.xlu2 %v682_v54, %s2422_s28 }
 0x993   :  { %v738_v25 = vpop.permute.xlu0 %737 }
 0x9ec   :  { %v689_v56 = vpop.permute.xlu2 %688 }
 0x9ed   :  { %2257 = vmatmul.msk.f32.vlgmr.msra.gmra.mxu2 %vm184_vm4, %v689_v56 }
 0x9ee   :  { %2269 = vmatpush.msk.msra.mxu2 %vm35_vm0, %v2482_v6 }
 0xa70   :  { %v709_v3 = vpop.f32.mrf.mxu2 }
 0xa71   :  { %v2813_v4 = vadd.f32 %v2810_v60, %v709_v3 }
 0xa73   :  { %731 = vmatpush.msra.mxu3 %v2813_v4 }
 0xa74   :  { %2258 = vmatmul.msk.f32.vlgmr.msra.gmra.mxu3 %vm331_vm6, %v2818_v20 }
 0xa75   :  { %843 = vmatpush.msrb.mxu3 %v2878_v53 }
 0xaf7   :  { %v733_v7 = vpop.f32.mrf.mxu3 }
 0xaf8   :  { %2260 = vmatmul.msk.f32.vlgmr.msrb.gmra.mxu0 %vm31_vm1, %v733_v7 }
 0xaf9   :  { %982 = vmatpush.msrb.mxu0 %v2524_v15 }
 0xafb   :  { %983 = vmatpush.msrb.mxu0 %v2530_v16 }
 0xb00   :  { %2266 = vmatmul.msk.f32.vlgmr.msra.gmra.mxu0 %vm31_vm1, %v2609_v57  ;;  %v2854_v57 = vld [vmem:[%s3216_s2 + $0xf0] ss:$0 sm:$0xff] }
 0xb75   :  { %v763_v27 = vpop.f32.mrf.mxu0 }
 0xb76   :  { %v764_v29 = vadd.f32 %v763_v27, %v738_v25  ;;  %v2913_v27 = vld [vmem:[%s3216_s2 + $0x118] ss:$0 sm:$0xff] }
 0xb78   :  { %v768_v35 = vadd.f32 %v2854_v57, %v764_v29 }
 0xb7a   :  { %v769_v43 = vmax.f32 %v768_v35, 0.0 }
 0xb7c   :  { %2261 = vmatmul.msk.f32.vlgmr.msrb.gmra.mxu1 %vm184_vm4, %v769_v43 }
 0xb7d   :  { %v2858_v45 = vpop.f32.mrf.mxu0  ;;  %2280 = vmatpush.msk.msrb.mxu1 %vm35_vm0, %v2547_v33 }
 0xb7e   :  { %895 = vrot.lane.b32.xlu1 %v2858_v45, %s2420_s20 }
 0xb84   :  { %2268 = vmatmul.msk.f32.vlgmr.msra.gmra.mxu1 %vm31_vm1, %v2663_v17  ;;  %v2883_v17 = vld [vmem:[%s3216_s2 + $0x120] sm:$0xff] }
 0xb85   :  { %2288 = vmatpush.msk.msra.mxu1 %vm35_vm0, %v2622_v59  ;;  %844 = vmatpush.msrb.mxu3 %v2883_v17 }
 0xbf0   :  { %v896_v7 = vpop.permute.xlu1 %895 }
 0xbf9   :  { %v794_v54 = vpop.f32.mrf.mxu1 }
 0xbfa   :  { %v2895_v56 = vadd.f32 %v2892_v28, %v794_v54 }
 0xbfc   :  { %2263 = vmatmul.msk.f32.vlgmr.msrb.gmra.mxu2 %vm31_vm1, %v2895_v56 }
 0xc01   :  { %v891_v3 = vpop.f32.mrf.mxu1 }
 0xc02   :  { %1029 = vrot.lane.b32.xlu2 %v891_v3, %s2420_s20  ;;  %2273 = vmatpush.msk.msra.mxu3 %vm142_vm2, %v891_v3 }
 0xc04   :  { %2270 = vmatmul.msk.f32.vlgmr.msra.gmra.mxu2 %vm31_vm1, %v2557_v36  ;;  %941 = vmatpush.msra.mxu3 %v896_v7 }
 0xc06   :  { %942 = vmatpush.msra.mxu3 %v2858_v45 }
 0xc0a   :  { %1105 = vrot.lane.b32.xlu2 %v891_v3, %s2422_s28 }
 0xc0c   :  { %2271 = vmatmul.msk.f32.gmra.mxu2 %vm31_vm1, %v2562_v38 }
 0xc14   :  { %2272 = vmatmul.msk.f32.gmra.mxu2 %vm31_vm1, %v2567_v40 }
 0xc5c   :  { %v1030_v25 = vpop.permute.xlu2 %1029 }
 0xc5d   :  { %2284 = vmatpush.msk.msrb.mxu2 %vm142_vm2, %v1030_v25 }
 0xc7f   :  { %v821_v36 = vpop.f32.mrf.mxu2 }
 0xc80   :  { %v822_v29 = vadd.f32 %v2913_v27, %v821_v36 }
 0xc82   :  { %v824_v35 = vmax.f32 %v822_v29, 0.0 }
 0xc84   :  { %2264 = vmatmul.msk.f32.vlgmr.msrb.gmra.mxu3 %vm184_vm4, %v824_v35 }
 0xc85   :  { %1079 = vmatpush.msrb.mxu3 %v2586_v47 }
 0xc87   :  { %1080 = vmatpush.msrb.mxu3 %v2591_v48  ;;  %v915_v40 = vpop.f32.mrf.mxu2 }
 0xc8c   :  { %2274 = vmatmul.msk.f32.vlgmr.msra.gmra.mxu3 %vm132_vm3, %v2501_v11 }
 0xc8d   :  { %2291 = vmatpush.msk.msra.mxu3 %vm35_vm0, %v2642_v63 }
 0xc8f   :  { %v918_v25 = vpop.f32.mrf.mxu2 }
 0xc94   :  { %2275 = vmatmul.msk.f32.gmra.mxu3 %vm132_vm3, %v2509_v13 }
 0xc97   :  { %v921_v13 = vpop.f32.mrf.mxu2 }
 0xc9c   :  { %2276 = vmatmul.msk.f32.gmra.mxu3 %vm132_vm3, %v2517_v14 }
 0xd07   :  { %v2927_v38 = vpop.f32.mrf.mxu3 }
 0xd08   :  { %3228 = vst [vmem:[#allocation10_spill] sm:$0xff] %v2927_v38 }
 0xd0f   :  { %v944_v43 = vpop.f32.mrf.mxu3 }
 0xd10   :  { %v945_v54 = vadd.f32 %v944_v43, %v915_v40 }
 0xd12   :  { %v953_v3 = vadd.f32 %v2536_v18, %v945_v54 }
 0xd14   :  { %v956_v7 = vmax.f32 %v953_v3, 0.0 }
 0xd16   :  { %2277 = vmatmul.msk.f32.vlgmr.msrb.gmra.mxu0 %vm184_vm4, %v956_v7 }
 0xd17   :  { %v947_v36 = vpop.f32.mrf.mxu3 }
 0xd18   :  { %v948_v29 = vadd.f32 %v947_v36, %v918_v25 }
 0xd1a   :  { %v954_v35 = vadd.f32 %v2536_v18, %v948_v29 }
 0xd1c   :  { %v957_v63 = vmax.f32 %v954_v35, 0.0 }
 0xd1e   :  { %2278 = vmatmul.msk.f32.gmra.mxu0 %vm184_vm4, %v957_v63 }
 0xd1f   :  { %v950_v14 = vpop.f32.mrf.mxu3 }
 0xd20   :  { %v951_v11 = vadd.f32 %v950_v14, %v921_v13 }
 0xd22   :  { %v955_v38 = vadd.f32 %v2536_v18, %v951_v11 }
 0xd24   :  { %v958_v48 = vmax.f32 %v955_v38, 0.0 }
 0xd26   :  { %2279 = vmatmul.msk.f32.gmra.mxu0 %vm184_vm4, %v958_v48 }
 0xd93   :  { %v985_v40 = vpop.f32.mrf.mxu0 }
 0xd94   :  { %v2936_v43 = vadd.f32 %v2554_v34, %v985_v40 }
 0xd96   :  { %2281 = vmatmul.msk.f32.vlgmr.msrb.gmra.mxu1 %vm31_vm1, %v2936_v43 }
 0xd97   :  { %2294 = vmatpush.msk.msrb.mxu1 %vm35_vm0, %v2685_v24 }
 0xd9b   :  { %v988_v54 = vpop.f32.mrf.mxu0 }
 0xd9c   :  { %v2943_v63 = vadd.f32 %v2554_v34, %v988_v54 }
 0xd9e   :  { %2282 = vmatmul.msk.f32.gmra.mxu1 %vm31_vm1, %v2943_v63 }
 0xda3   :  { %v991_v11 = vpop.f32.mrf.mxu0 }
 0xda4   :  { %v2948_v13 = vadd.f32 %v2554_v34, %v991_v11  ;;  %v1106_v11 = vpop.permute.xlu2 %1105 }
 0xda6   :  { %2283 = vmatmul.msk.f32.gmra.mxu1 %vm31_vm1, %v2948_v13 }
 0xe13   :  { %v1020_v14 = vpop.f32.mrf.mxu1 }
 0xe1b   :  { %v1023_v48 = vpop.f32.mrf.mxu1 }
 0xe23   :  { %v1026_v38 = vpop.f32.mrf.mxu1 }
 0xe24   :  { %1046 = vmatpush.msrb.mxu2 %v1026_v38 }
 0xe26   :  { %1047 = vmatpush.msrb.mxu2 %v1023_v48 }
 0xe28   :  { %1048 = vmatpush.msrb.mxu2 %v1020_v14 }
 0xe29   :  { %2285 = vmatmul.msk.f32.vlgmr.msrb.gmra.mxu2 %vm262_vm5, %v2574_v44 }
 0xe2a   :  { %1150 = vmatpush.msra.mxu2 %v2630_v61 }
 0xe2c   :  { %1151 = vmatpush.msra.mxu2 %v2636_v62 }
 0xeac   :  { %v1050_v3 = vpop.f32.mrf.mxu2 }
 0xead   :  { %1054 = vrot.lane.b32.xlu0 %v1050_v3, %s2421_s21 }
 0xf1f   :  { %v1055_v7 = vpop.permute.xlu0 %1054 }
 0xf20   :  { %v1057_v25 = vadd.f32 %v1055_v7, %v2858_v45 }
 0xf22   :  { %v1058_v36 = vadd.f32 %v1057_v25, %v2596_v51 }
 0xf24   :  { %v1059_v29 = vmax.f32 %v1058_v36, 0.0 }
 0xf26   :  { %1061 = vrot.lane.b32.xlu1 %v1059_v29, %s2422_s28 }
 0xf98   :  { %v1062_v35 = vpop.permute.xlu1 %1061 }
 0xf99   :  { %2286 = vmatmul.msk.f32.vlgmr.msrb.gmra.mxu3 %vm184_vm4, %v1062_v35 }
 0xf9a   :  { %1295 = vmatpush.msrb.mxu3 %v2729_v37 }
 0xf9c   :  { %1296 = vmatpush.msrb.mxu3 %v2735_v39 }
 0xfa1   :  { %2292 = vmatmul.msk.f32.vlgmr.msra.gmra.mxu3 %vm31_vm1, %v2813_v4 }
0x101c   :  { %v1082_v40 = vpop.f32.mrf.mxu3 }
0x101d   :  { %v2966_v54 = vadd.f32 %v2606_v55, %v1082_v40 }
0x101f   :  { %1100 = vmatpush.msra.mxu0 %v2966_v54 }
0x1020   :  { %2287 = vmatmul.msk.f32.vlgmr.msra.gmra.mxu0 %vm331_vm6, %v2614_v58 }
0x1021   :  { %1202 = vmatpush.msrb.mxu0 %v2670_v19 }
0x1023   :  { %2305 = vmatpush.msk.msra.mxu0 %vm35_vm0, %v2752_v8 }
0x1024   :  { %v2974_v45 = vpop.f32.mrf.mxu3 }
0x1025   :  { %1208 = vrot.lane.b32.xlu1 %v2974_v45, %s2420_s20 }
0x1097   :  { %v1209_v36 = vpop.permute.xlu1 %1208 }
0x109d   :  { %v1102_v4 = vpop.f32.mrf.mxu0 }
0x109e   :  { %2289 = vmatmul.msk.f32.vlgmr.msra.gmra.mxu1 %vm31_vm1, %v1102_v4 }
0x10a6   :  { %2295 = vmatmul.msk.f32.vlgmr.msrb.gmra.mxu1 %vm31_vm1, %v2762_v21 }
0x10ae   :  { %2296 = vmatmul.msk.f32.gmra.mxu1 %vm31_vm1, %v2767_v23 }
0x10b6   :  { %2297 = vmatmul.msk.f32.gmra.mxu1 %vm31_vm1, %v2772_v26 }
0x111b   :  { %v1128_v14 = vpop.f32.mrf.mxu1 }
0x111c   :  { %v1129_v48 = vadd.f32 %v1128_v14, %v1106_v11 }
0x111e   :  { %v1131_v38 = vadd.f32 %v2649_v1, %v1129_v48 }
0x1120   :  { %v1132_v3 = vmax.f32 %v1131_v38, 0.0 }
0x1122   :  { %2290 = vmatmul.msk.f32.vlgmr.msra.gmra.mxu2 %vm184_vm4, %v1132_v3 }
0x1123   :  { %v1228_v29 = vpop.f32.mrf.mxu1 }
0x112b   :  { %v1231_v14 = vpop.f32.mrf.mxu1 }
0x11a5   :  { %v1153_v7 = vpop.f32.mrf.mxu2 }
0x11a6   :  { %v2988_v25 = vadd.f32 %v2660_v10, %v1153_v7 }
0x11a8   :  { %1157 = vrot.lane.b32.xlu0 %v2988_v25, %s2423_s22 }
0x121a   :  { %v1158_v21 = vpop.permute.xlu0 %1157 }
0x121b   :  { %v1160_v23 = vsel %vm31_vm1, %v2895_v56, %v1158_v21  ;;  %v1234_v21 = vpop.f32.mrf.mxu1 }
0x121c   :  { %2293 = vmatmul.msk.f32.vlgmr.msrb.gmra.mxu0 %vm331_vm6, %v1160_v23 }
0x121d   :  { %2313 = vmatpush.msk.msrb.mxu0 %vm35_vm0, %v2826_v5 }
0x1299   :  { %v1204_v26 = vpop.f32.mrf.mxu0 }
0x129a   :  { %1342 = vrot.lane.b32.xlu2 %v1204_v26, %s2420_s20  ;;  %2298 = vmatpush.msk.msrb.mxu2 %vm142_vm2, %v1204_v26 }
0x129c   :  { %1254 = vmatpush.msrb.mxu2 %v1209_v36 }
0x129e   :  { %1255 = vmatpush.msrb.mxu2 %v2974_v45 }
0x129f   :  { %2299 = vmatmul.msk.f32.vlgmr.msrb.gmra.mxu2 %vm132_vm3, %v2706_v30 }
0x12a0   :  { %1392 = vmatpush.msra.mxu2 %v2792_v46 }
0x12a2   :  { %1418 = vrot.lane.b32.xlu2 %v1204_v26, %s2422_s28  ;;  %1393 = vmatpush.msra.mxu2 %v2797_v49 }
0x12a4   :  { %2316 = vmatpush.msk.msrb.mxu2 %vm35_vm0, %v2871_v50 }
0x12a7   :  { %2300 = vmatmul.msk.f32.gmra.mxu2 %vm132_vm3, %v2714_v31 }
0x12af   :  { %2301 = vmatmul.msk.f32.gmra.mxu2 %vm132_vm3, %v2721_v32 }
0x12f4   :  { %v1343_v56 = vpop.permute.xlu2 %1342 }
0x12f5   :  { %2309 = vmatpush.msk.msra.mxu1 %vm142_vm2, %v1343_v56 }
0x1322   :  { %v1257_v35 = vpop.f32.mrf.mxu2 }
0x1323   :  { %v1258_v40 = vadd.f32 %v1257_v35, %v1228_v29 }
0x1325   :  { %v1266_v4 = vadd.f32 %v2741_v42, %v1258_v40 }
0x1327   :  { %v1269_v11 = vmax.f32 %v1266_v4, 0.0 }
0x1329   :  { %2302 = vmatmul.msk.f32.vlgmr.msrb.gmra.mxu3 %vm184_vm4, %v1269_v11 }
0x132a   :  { %v1260_v48 = vpop.f32.mrf.mxu2 }
0x132b   :  { %v1261_v38 = vadd.f32 %v1260_v48, %v1231_v14 }
0x132d   :  { %v1267_v3 = vadd.f32 %v2741_v42, %v1261_v38 }
0x132f   :  { %v1270_v7 = vmax.f32 %v1267_v3, 0.0 }
0x1331   :  { %2303 = vmatmul.msk.f32.gmra.mxu3 %vm184_vm4, %v1270_v7 }
0x1332   :  { %v1263_v23 = vpop.f32.mrf.mxu2 }
0x1333   :  { %v1264_v26 = vadd.f32 %v1263_v23, %v1234_v21 }
0x1335   :  { %v1268_v36 = vadd.f32 %v2741_v42, %v1264_v26 }
0x1337   :  { %v1271_v56 = vmax.f32 %v1268_v36, 0.0 }
0x1339   :  { %2304 = vmatmul.msk.f32.gmra.mxu3 %vm184_vm4, %v1271_v56 }
0x13ac   :  { %v1298_v29 = vpop.f32.mrf.mxu3 }
0x13ad   :  { %v3019_v35 = vadd.f32 %v2759_v9, %v1298_v29 }
0x13af   :  { %2306 = vmatmul.msk.f32.vlgmr.msra.gmra.mxu0 %vm31_vm1, %v3019_v35 }
0x13b0   :  { %2319 = vmatpush.msk.msra.mxu0 %vm35_vm0, %v2450_v0 }
0x13b4   :  { %v1301_v40 = vpop.f32.mrf.mxu3 }
0x13b5   :  { %v3026_v4 = vadd.f32 %v2759_v9, %v1301_v40 }
0x13b7   :  { %2307 = vmatmul.msk.f32.gmra.mxu0 %vm31_vm1, %v3026_v4 }
0x13bc   :  { %v1304_v11 = vpop.f32.mrf.mxu3 }
0x13bd   :  { %v3031_v14 = vadd.f32 %v2759_v9, %v1304_v11 }
0x13bf   :  { %2308 = vmatmul.msk.f32.gmra.mxu0 %vm31_vm1, %v3031_v14 }
0x142c   :  { %v1333_v48 = vpop.f32.mrf.mxu0 }
0x1434   :  { %v1336_v38 = vpop.f32.mrf.mxu0 }
0x143c   :  { %v1339_v3 = vpop.f32.mrf.mxu0 }
0x143d   :  { %1359 = vmatpush.msra.mxu1 %v1339_v3 }
0x143f   :  { %1360 = vmatpush.msra.mxu1 %v1336_v38 }
0x1441   :  { %1361 = vmatpush.msra.mxu1 %v1333_v48 }
0x1442   :  { %2310 = vmatmul.msk.f32.vlgmr.msra.gmra.mxu1 %vm262_vm5, %v2779_v41 }
0x1443   :  { %1463 = vmatpush.msrb.mxu1 %v2840_v12 }
0x1445   :  { %1464 = vmatpush.msrb.mxu1 %v2846_v22 }
0x1447   :  { %2321 = vmatpush.msk.msra.mxu1 %vm35_vm0, %v2460_v2 }
0x14bf   :  { %v1363_v0 = vpop.f32.mrf.mxu1 }
0x14c0   :  { %1367 = vrot.lane.b32.xlu0 %v1363_v0, %s2421_s21 }
0x1532   :  { %v1368_v7 = vpop.permute.xlu0 %1367 }
0x1533   :  { %v1370_v21 = vadd.f32 %v1368_v7, %v2974_v45  ;;  %v3230_v7 = vld [vmem:[#allocation5_spill] sm:$0xff] }
0x1535   :  { %v1371_v23 = vadd.f32 %v1370_v21, %v2801_v52  ;;  %v3233_v21 = vld [vmem:[#allocation7_spill] sm:$0xff] }
0x1537   :  { %v1372_v26 = vmax.f32 %v1371_v23, 0.0 }
0x1539   :  { %1374 = vrot.lane.b32.xlu1 %v1372_v26, %s2422_s28 }
0x15ab   :  { %v1375_v36 = vpop.permute.xlu1 %1374 }
0x15ac   :  { %2311 = vmatmul.msk.f32.vlgmr.msra.gmra.mxu2 %vm184_vm4, %v1375_v36 }
0x15ad   :  { %2323 = vmatpush.msk.msra.mxu2 %vm35_vm0, %v2482_v6  ;;  %v1419_v6 = vpop.permute.xlu2 %1418 }
0x162f   :  { %v1395_v56 = vpop.f32.mrf.mxu2 }
0x1630   :  { %v3049_v2 = vadd.f32 %v2810_v60, %v1395_v56 }
0x1632   :  { %1413 = vmatpush.msra.mxu3 %v3049_v2 }
0x1633   :  { %2312 = vmatmul.msk.f32.vlgmr.msra.gmra.mxu3 %vm331_vm6, %v2818_v20 }
0x1634   :  { %1510 = vmatpush.msrb.mxu3 %v2878_v53 }
0x1636   :  { %1511 = vmatpush.msrb.mxu3 %v2883_v17 }
0x16b6   :  { %v1415_v45 = vpop.f32.mrf.mxu3 }
0x16b7   :  { %2314 = vmatmul.msk.f32.vlgmr.msrb.gmra.mxu0 %vm31_vm1, %v1415_v45 }
0x16b8   :  { %1649 = vmatpush.msrb.mxu0 %v2524_v15 }
0x16ba   :  { %1650 = vmatpush.msrb.mxu0 %v2530_v16 }
0x16bf   :  { %2320 = vmatmul.msk.f32.vlgmr.msra.gmra.mxu0 %vm31_vm1, %v2966_v54 }
0x1734   :  { %v1441_v29 = vpop.f32.mrf.mxu0 }
0x1735   :  { %v1442_v40 = vadd.f32 %v1441_v29, %v1419_v6 }
0x1737   :  { %v1444_v11 = vadd.f32 %v2854_v57, %v1442_v40 }
0x1739   :  { %v1445_v48 = vmax.f32 %v1444_v11, 0.0 }
0x173b   :  { %2315 = vmatmul.msk.f32.vlgmr.msrb.gmra.mxu1 %vm184_vm4, %v1445_v48 }
0x173c   :  { %v3063_v38 = vpop.f32.mrf.mxu0  ;;  %2334 = vmatpush.msk.msrb.mxu1 %vm35_vm0, %v2547_v33 }
0x173d   :  { %1562 = vrot.lane.b32.xlu0 %v3063_v38, %s2420_s20 }
0x1743   :  { %2322 = vmatmul.msk.f32.vlgmr.msra.gmra.mxu1 %vm31_vm1, %v2988_v25 }
0x1744   :  { %2342 = vmatpush.msk.msra.mxu1 %vm35_vm0, %v2622_v59 }
0x17af   :  { %v1563_v33 = vpop.permute.xlu0 %1562 }
0x17b8   :  { %v1466_v15 = vpop.f32.mrf.mxu1 }
0x17b9   :  { %v3074_v16 = vadd.f32 %v2892_v28, %v1466_v15 }
0x17bb   :  { %2317 = vmatmul.msk.f32.vlgmr.msrb.gmra.mxu2 %vm31_vm1, %v3074_v16 }
0x17c0   :  { %v1558_v54 = vpop.f32.mrf.mxu1 }
0x17c1   :  { %1696 = vrot.lane.b32.xlu1 %v1558_v54, %s2420_s20  ;;  %2327 = vmatpush.msk.msra.mxu3 %vm142_vm2, %v1558_v54 }
0x17c3   :  { %2324 = vmatmul.msk.f32.vlgmr.msra.gmra.mxu2 %vm31_vm1, %v2936_v43  ;;  %1608 = vmatpush.msra.mxu3 %v1563_v33  ;;  %v3229_v43 = vld [vmem:[#allocation8_spill] sm:$0xff] }
0x17c5   :  { %1609 = vmatpush.msra.mxu3 %v3063_v38 }
0x17c9   :  { %1772 = vrot.lane.b32.xlu1 %v1558_v54, %s2422_s28 }
0x17cb   :  { %2325 = vmatmul.msk.f32.gmra.mxu2 %vm31_vm1, %v2943_v63  ;;  %v3231_v63 = vld [vmem:[#allocation9_spill] sm:$0xff] }
0x17d3   :  { %2326 = vmatmul.msk.f32.gmra.mxu2 %vm31_vm1, %v2948_v13  ;;  %v3232_v13 = vld [vmem:[#allocation6_spill] sm:$0xff] }
0x1833   :  { %v1697_v59 = vpop.permute.xlu1 %1696 }
0x1834   :  { %2338 = vmatpush.msk.msrb.mxu2 %vm142_vm2, %v1697_v59 }
0x183e   :  { %v1489_v25 = vpop.f32.mrf.mxu2 }
0x183f   :  { %v1490_v3 = vadd.f32 %v2913_v27, %v1489_v25 }
0x1841   :  { %v1492_v0 = vmax.f32 %v1490_v3, 0.0 }
0x1843   :  { %2318 = vmatmul.msk.f32.vlgmr.msrb.gmra.mxu3 %vm184_vm4, %v1492_v0 }
0x1844   :  { %1746 = vmatpush.msrb.mxu3 %v2586_v47 }
0x1846   :  { %1747 = vmatpush.msrb.mxu3 %v3229_v43  ;;  %v1582_v26 = vpop.f32.mrf.mxu2 }
0x184b   :  { %2328 = vmatmul.msk.f32.vlgmr.msra.gmra.mxu3 %vm132_vm3, %v3230_v7 }
0x184c   :  { %2345 = vmatpush.msk.msra.mxu3 %vm35_vm0, %v3231_v63 }
0x184e   :  { %v1585_v6 = vpop.f32.mrf.mxu2 }
0x1853   :  { %2329 = vmatmul.msk.f32.gmra.mxu3 %vm132_vm3, %v3232_v13 }
0x1856   :  { %v1588_v15 = vpop.f32.mrf.mxu2 }
0x185b   :  { %2330 = vmatmul.msk.f32.gmra.mxu3 %vm132_vm3, %v3233_v21 }
0x18c6   :  { %v3101_v23 = vpop.f32.mrf.mxu3 }
0x18ce   :  { %v1611_v36 = vpop.f32.mrf.mxu3 }
0x18cf   :  { %v1612_v56 = vadd.f32 %v1611_v36, %v1582_v26 }
0x18d1   :  { %v1620_v47 = vadd.f32 %v2536_v18, %v1612_v56 }
0x18d3   :  { %v1623_v45 = vmax.f32 %v1620_v47, 0.0 }
0x18d5   :  { %2331 = vmatmul.msk.f32.vlgmr.msrb.gmra.mxu0 %vm184_vm4, %v1623_v45 }
0x18d6   :  { %v1614_v29 = vpop.f32.mrf.mxu3 }
0x18d7   :  { %v1615_v40 = vadd.f32 %v1614_v29, %v1585_v6 }
0x18d9   :  { %v1621_v11 = vadd.f32 %v2536_v18, %v1615_v40 }
0x18db   :  { %v1624_v48 = vmax.f32 %v1621_v11, 0.0 }
0x18dd   :  { %2332 = vmatmul.msk.f32.gmra.mxu0 %vm184_vm4, %v1624_v48 }
0x18de   :  { %v1617_v54 = vpop.f32.mrf.mxu3 }
0x18df   :  { %v1618_v33 = vadd.f32 %v1617_v54, %v1588_v15 }
0x18e1   :  { %v1622_v59 = vadd.f32 %v2536_v18, %v1618_v33 }
0x18e3   :  { %v1625_v25 = vmax.f32 %v1622_v59, 0.0 }
0x18e5   :  { %2333 = vmatmul.msk.f32.gmra.mxu0 %vm184_vm4, %v1625_v25 }
0x1952   :  { %v1652_v3 = vpop.f32.mrf.mxu0 }
0x1953   :  { %v1653_v0 = vadd.f32 %v2554_v34, %v1652_v3 }
0x1955   :  { %2335 = vmatmul.msk.f32.vlgmr.msrb.gmra.mxu1 %vm31_vm1, %v1653_v0 }
0x1956   :  { %2348 = vmatpush.msk.msrb.mxu1 %vm35_vm0, %v2685_v24 }
0x195a   :  { %v1655_v43 = vpop.f32.mrf.mxu0 }
0x195b   :  { %v1656_v7 = vadd.f32 %v2554_v34, %v1655_v43 }
0x195d   :  { %2336 = vmatmul.msk.f32.gmra.mxu1 %vm31_vm1, %v1656_v7 }
0x1962   :  { %v1658_v63 = vpop.f32.mrf.mxu0 }
0x1963   :  { %v1659_v13 = vadd.f32 %v2554_v34, %v1658_v63 }
0x1965   :  { %2337 = vmatmul.msk.f32.gmra.mxu1 %vm31_vm1, %v1659_v13 }
0x19d2   :  { %v1687_v18 = vpop.f32.mrf.mxu1 }
0x19da   :  { %v1690_v21 = vpop.f32.mrf.mxu1 }
0x19e2   :  { %v1693_v26 = vpop.f32.mrf.mxu1 }
0x19e3   :  { %1713 = vmatpush.msrb.mxu2 %v1693_v26 }
0x19e5   :  { %1714 = vmatpush.msrb.mxu2 %v1690_v21 }
0x19e7   :  { %1715 = vmatpush.msrb.mxu2 %v1687_v18 }
0x19e8   :  { %2339 = vmatmul.msk.f32.vlgmr.msrb.gmra.mxu2 %vm262_vm5, %v2574_v44 }
0x19e9   :  { %1817 = vmatpush.msra.mxu2 %v2630_v61 }
0x19eb   :  { %1818 = vmatpush.msra.mxu2 %v2636_v62 }
0x1a6b   :  { %v1717_v24 = vpop.f32.mrf.mxu2 }
0x1a6c   :  { %1721 = vrot.lane.b32.xlu2 %v1717_v24, %s2421_s21 }
0x1ac6   :  { %v1722_v36 = vpop.permute.xlu2 %1721 }
0x1ac7   :  { %v1724_v34 = vadd.f32 %v1722_v36, %v3063_v38 }
0x1ac9   :  { %v1725_v56 = vadd.f32 %v1724_v34, %v2596_v51 }
0x1acb   :  { %v1726_v47 = vmax.f32 %v1725_v56, 0.0 }
0x1acd   :  { %1728 = vrot.lane.b32.xlu0 %v1726_v47, %s2422_s28 }
0x1b3f   :  { %v1729_v45 = vpop.permute.xlu0 %1728 }
0x1b40   :  { %2340 = vmatmul.msk.f32.vlgmr.msrb.gmra.mxu3 %vm184_vm4, %v1729_v45 }
0x1b41   :  { %1962 = vmatpush.msrb.mxu3 %v2729_v37 }
0x1b43   :  { %1963 = vmatpush.msrb.mxu3 %v2735_v39 }
0x1b48   :  { %2346 = vmatmul.msk.f32.vlgmr.msra.gmra.mxu3 %vm31_vm1, %v3049_v2 }
0x1bc3   :  { %v1749_v44 = vpop.f32.mrf.mxu3 }
0x1bc4   :  { %v1750_v61 = vadd.f32 %v2606_v55, %v1749_v44  ;;  %v1773_v55 = vpop.permute.xlu1 %1772 }
0x1bc6   :  { %1767 = vmatpush.msra.mxu0 %v1750_v61 }
0x1bc7   :  { %2341 = vmatmul.msk.f32.vlgmr.msra.gmra.mxu0 %vm331_vm6, %v2614_v58 }
0x1bc8   :  { %1869 = vmatpush.msrb.mxu0 %v2670_v19 }
0x1bca   :  { %2359 = vmatpush.msk.msra.mxu0 %vm35_vm0, %v2752_v8 }
0x1bcb   :  { %v3136_v51 = vpop.f32.mrf.mxu3 }
0x1bcc   :  { %1875 = vrot.lane.b32.xlu0 %v3136_v51, %s2420_s20 }
0x1c44   :  { %v1769_v62 = vpop.f32.mrf.mxu0 }
0x1c45   :  { %2343 = vmatmul.msk.f32.vlgmr.msra.gmra.mxu1 %vm31_vm1, %v1769_v62 }
0x1c4d   :  { %2349 = vmatmul.msk.f32.vlgmr.msrb.gmra.mxu1 %vm31_vm1, %v3019_v35 }
0x1c55   :  { %2350 = vmatmul.msk.f32.gmra.mxu1 %vm31_vm1, %v3026_v4 }
0x1c5d   :  { %2351 = vmatmul.msk.f32.gmra.mxu1 %vm31_vm1, %v3031_v14 }
0x1cc2   :  { %v1795_v58 = vpop.f32.mrf.mxu1 }
0x1cc3   :  { %v1796_v19 = vadd.f32 %v1795_v58, %v1773_v55 }
0x1cc5   :  { %v1798_v37 = vadd.f32 %v2649_v1, %v1796_v19  ;;  %v1876_v1 = vpop.permute.xlu0 %1875 }
0x1cc7   :  { %v1799_v39 = vmax.f32 %v1798_v37, 0.0 }
0x1cc9   :  { %2344 = vmatmul.msk.f32.vlgmr.msra.gmra.mxu2 %vm184_vm4, %v1799_v39 }
0x1d4c   :  { %v1820_v8 = vpop.f32.mrf.mxu2 }
0x1d4d   :  { %v1821_v2 = vadd.f32 %v2660_v10, %v1820_v8 }
0x1d4f   :  { %1824 = vrot.lane.b32.xlu2 %v1821_v2, %s2423_s22 }
0x1da9   :  { %v1825_v35 = vpop.permute.xlu2 %1824 }
0x1daa   :  { %v1827_v4 = vsel %vm31_vm1, %v3074_v16, %v1825_v35 }
0x1dab   :  { %2347 = vmatmul.msk.f32.vlgmr.msrb.gmra.mxu0 %vm331_vm6, %v1827_v4 }
0x1dac   :  { %2367 = vmatpush.msk.msrb.mxu0 %vm35_vm0, %v2826_v5  ;;  %v1895_v5 = vpop.f32.mrf.mxu1 }
0x1db4   :  { %v1898_v6 = vpop.f32.mrf.mxu1 }
0x1e28   :  { %v1871_v14 = vpop.f32.mrf.mxu0 }
0x1e29   :  { %2009 = vrot.lane.b32.xlu1 %v1871_v14, %s2420_s20  ;;  %2352 = vmatpush.msk.msrb.mxu2 %vm142_vm2, %v1871_v14 }
0x1e2b   :  { %1921 = vmatpush.msrb.mxu2 %v1876_v1 }
0x1e2d   :  { %1922 = vmatpush.msrb.mxu2 %v3136_v51 }
0x1e2e   :  { %2353 = vmatmul.msk.f32.vlgmr.msrb.gmra.mxu2 %vm132_vm3, %v2706_v30 }
0x1e2f   :  { %2059 = vmatpush.msra.mxu2 %v2792_v46 }
0x1e31   :  { %2085 = vrot.lane.b32.xlu1 %v1871_v14, %s2422_s28  ;;  %2060 = vmatpush.msra.mxu2 %v2797_v49 }
0x1e33   :  { %2370 = vmatpush.msk.msrb.mxu2 %vm35_vm0, %v2871_v50 }
0x1e36   :  { %2354 = vmatmul.msk.f32.gmra.mxu2 %vm132_vm3, %v2714_v31 }
0x1e3e   :  { %2355 = vmatmul.msk.f32.gmra.mxu2 %vm132_vm3, %v2721_v32  ;;  %v1901_v32 = vpop.f32.mrf.mxu1 }
0x1e9b   :  { %v2010_v10 = vpop.permute.xlu1 %2009 }
0x1e9c   :  { %2363 = vmatpush.msk.msra.mxu1 %vm142_vm2, %v2010_v10 }
0x1eb1   :  { %v1924_v30 = vpop.f32.mrf.mxu2 }
0x1eb2   :  { %v1925_v38 = vadd.f32 %v1924_v30, %v1895_v5 }
0x1eb4   :  { %v1933_v46 = vadd.f32 %v2741_v42, %v1925_v38 }
0x1eb6   :  { %v1936_v16 = vmax.f32 %v1933_v46, 0.0 }
0x1eb8   :  { %2356 = vmatmul.msk.f32.vlgmr.msrb.gmra.mxu3 %vm184_vm4, %v1936_v16 }
0x1eb9   :  { %v1927_v49 = vpop.f32.mrf.mxu2 }
0x1eba   :  { %v1928_v50 = vadd.f32 %v1927_v49, %v1898_v6 }
0x1ebc   :  { %v1934_v29 = vadd.f32 %v2741_v42, %v1928_v50 }
0x1ebe   :  { %v1937_v31 = vmax.f32 %v1934_v29, 0.0 }
0x1ec0   :  { %2357 = vmatmul.msk.f32.gmra.mxu3 %vm184_vm4, %v1937_v31 }
0x1ec1   :  { %v1930_v40 = vpop.f32.mrf.mxu2 }
0x1ec2   :  { %v1931_v11 = vadd.f32 %v1930_v40, %v1901_v32 }
0x1ec4   :  { %v1935_v48 = vadd.f32 %v2741_v42, %v1931_v11 }
0x1ec6   :  { %v1938_v15 = vmax.f32 %v1935_v48, 0.0 }
0x1ec8   :  { %2358 = vmatmul.msk.f32.gmra.mxu3 %vm184_vm4, %v1938_v15 }
0x1f3b   :  { %v1965_v54 = vpop.f32.mrf.mxu3 }
0x1f3c   :  { %v1966_v33 = vadd.f32 %v2759_v9, %v1965_v54 }
0x1f3e   :  { %2360 = vmatmul.msk.f32.vlgmr.msra.gmra.mxu0 %vm31_vm1, %v1966_v33 }
0x1f43   :  { %v1968_v59 = vpop.f32.mrf.mxu3 }
0x1f44   :  { %v1969_v25 = vadd.f32 %v2759_v9, %v1968_v59 }
0x1f46   :  { %2361 = vmatmul.msk.f32.gmra.mxu0 %vm31_vm1, %v1969_v25 }
0x1f4b   :  { %v1971_v3 = vpop.f32.mrf.mxu3 }
0x1f4c   :  { %v1972_v0 = vadd.f32 %v2759_v9, %v1971_v3  ;;  %v2393_v9 = vld [vmem:[%s3216_s2 + $0x130] ss:$0 sm:$0xff]  ;;  %s2425_s2 = smov 16  }
0x1f4d   :  { %v1514_v13 = vadd.f32 %v2393_v9, %v3101_v23 }
0x1f4e   :  { %2362 = vmatmul.msk.f32.gmra.mxu0 %vm31_vm1, %v1972_v0 }
0x1fbb   :  { %v2000_v43 = vpop.f32.mrf.mxu0 }
0x1fc3   :  { %v2003_v42 = vpop.f32.mrf.mxu0 }
0x1fcb   :  { %v2006_v7 = vpop.f32.mrf.mxu0 }
0x1fcc   :  { %2026 = vmatpush.msra.mxu1 %v2006_v7 }
0x1fce   :  { %2027 = vmatpush.msra.mxu1 %v2003_v42 }
0x1fd0   :  { %2028 = vmatpush.msra.mxu1 %v2000_v43 }
0x1fd1   :  { %2364 = vmatmul.msk.f32.vlgmr.msra.gmra.mxu1 %vm262_vm5, %v2779_v41 }
0x1fd2   :  { %2130 = vmatpush.msrb.mxu1 %v2840_v12 }
0x1fd4   :  { %2131 = vmatpush.msrb.mxu1 %v2846_v22 }
0x204e   :  { %v2030_v63 = vpop.f32.mrf.mxu1 }
0x204f   :  { %2034 = vrot.lane.b32.xlu2 %v2030_v63, %s2421_s21  ;;  %s2426_s21 = smov [#allocation2]  }
0x2057   :  { %2184 = vrot.lane.b32.xlu2 %v1514_v13, %s2424_s6 }
0x20a9   :  { %v2035_v18 = vpop.permute.xlu2 %2034 }
0x20aa   :  { %v2037_v21 = vadd.f32 %v2035_v18, %v3136_v51 }
0x20ac   :  { %v2038_v41 = vadd.f32 %v2037_v21, %v2801_v52  ;;  %v2086_v52 = vpop.permute.xlu1 %2085 }
0x20ae   :  { %v2039_v26 = vmax.f32 %v2038_v41, 0.0 }
0x20b0   :  { %2041 = vrot.lane.b32.xlu0 %v2039_v26, %s2422_s28  ;;  %s2200_s28 = sshll.u32 %s2426_s21, 4  ;;  %s2201_s28 = int_to_ptr.vmem [resolvable:$true] %s2200_s28 }
0x20b1   :  { %v2185_v51 = vpop.permute.xlu2 %2184 }
0x2122   :  { %v2042_v12 = vpop.permute.xlu0 %2041 }
0x2123   :  { %2365 = vmatmul.msk.f32.vlgmr.msra.gmra.mxu2 %vm184_vm4, %v2042_v12 }
0x21a6   :  { %v2062_v22 = vpop.f32.mrf.mxu2 }
0x21a7   :  { %v2063_v24 = vadd.f32 %v2810_v60, %v2062_v22 }
0x21a9   :  { %2080 = vmatpush.msra.mxu3 %v2063_v24 }
0x21aa   :  { %2366 = vmatmul.msk.f32.vlgmr.msra.gmra.mxu3 %vm331_vm6, %v2818_v20 }
0x21ab   :  { %2177 = vmatpush.msrb.mxu3 %v2878_v53 }
0x21ad   :  { %2178 = vmatpush.msrb.mxu3 %v2883_v17 }
0x222d   :  { %v2082_v23 = vpop.f32.mrf.mxu3 }
0x222e   :  { %2368 = vmatmul.msk.f32.vlgmr.msrb.gmra.mxu0 %vm31_vm1, %v2082_v23 }
0x22ab   :  { %v2108_v36 = vpop.f32.mrf.mxu0 }
0x22ac   :  { %v2109_v34 = vadd.f32 %v2108_v36, %v2086_v52 }
0x22ae   :  { %v2111_v56 = vadd.f32 %v2854_v57, %v2109_v34  ;;  %v3234_v57 = vld [vmem:[#allocation10_spill] sm:$0xff] }
0x22b0   :  { %v2112_v47 = vmax.f32 %v2111_v56, 0.0 }
0x22b2   :  { %2369 = vmatmul.msk.f32.vlgmr.msrb.gmra.mxu1 %vm184_vm4, %v2112_v47 }
0x232f   :  { %v2133_v60 = vpop.f32.mrf.mxu1 }
0x2330   :  { %v2134_v45 = vadd.f32 %v2892_v28, %v2133_v60  ;;  %v847_v28 = vadd.f32 %v2393_v9, %v3234_v57 }
0x2332   :  { %2371 = vmatmul.msk.f32.vlgmr.msrb.gmra.mxu2 %vm31_vm1, %v2134_v45  ;;  %v2191_v62 = vsel %vm331_vm6, %v847_v28, %v2185_v51 }
0x23b5   :  { %v2156_v20 = vpop.f32.mrf.mxu2 }
0x23b6   :  { %v2157_v53 = vadd.f32 %v2913_v27, %v2156_v20 }
0x23b8   :  { %v2159_v17 = vmax.f32 %v2157_v53, 0.0 }
0x23ba   :  { %2372 = vmatmul.msk.f32.vlgmr.msrb.gmra.mxu3 %vm184_vm4, %v2159_v17 }
0x243d   :  { %v2180_v44 = vpop.f32.mrf.mxu3 }
0x243e   :  { %v2181_v61 = vadd.f32 %v2393_v9, %v2180_v44 }
0x2440   :  { %2188 = vrot.lane.b32.xlu0 %v2181_v61, %s2425_s2 }
0x24b2   :  { %v2189_v27 = vpop.permute.xlu0 %2188 }
0x24b3   :  { %v2192_v55 = vsel %vm184_vm4, %v2191_v62, %v2189_v27 }
0x24b4   :  { %2194 = vst.msk [vmem:[#allocation2] sm:$0x3] %vm2193_vm7, %v2192_v55 }
0x24b5   :  { %2205 = dma.vmem_to_hbm [thread:$0]  %s2201_s28, 32, %s2203_s9, [#allocation3]  }
0x24b6   :  { %2418 = dma.done.wait [#allocation3], 32  }
0x24b7   :  { %2419 = vsyncadd [#allocation3], 4294967264 }
0x24b8   :  { %2210 = vsyncpa [#allocation3], 1 }

</bundles_post_ra>
